<compile_context>
chip_gen: v7x
topology: tpu7x:2x2x1
jax: 0.10.0
libtpu: 0.0.40
codegen_flags: <defaults>
</compile_context>

<pallas_src>
import functools

import jax
import jax.numpy as jnp
from jax.experimental import pallas as pl
from jax.experimental.pallas import tpu as pltpu

_MASK_VALUE = -1e30  # large finite negative (NaN-safe, unlike -inf)


def _attn_kernel(xq_ref, xkv_ref, wqkv_ref, bqkv_ref, wproj_ref, bproj_ref,
                 o_ref, q_s, m_s, l_s, acc_s, *, n_head):
    H = n_head
    TQ, C = q_s.shape
    TK = xkv_ref.shape[1]
    D = C // H

    qi = pl.program_id(1)
    ki = pl.program_id(2)
    nk = pl.num_programs(2)

    # ---- start of a kv sweep: project the q tile once (scale already folded
    #      into the weights) and reset the online-softmax state ----
    @pl.when(ki == 0)
    def _():
        q = jnp.dot(xq_ref[0], wqkv_ref[:, :C],
                    preferred_element_type=jnp.float32) + bqkv_ref[:, :C]
        q_s[...] = q.astype(jnp.bfloat16)
        m_s[...] = jnp.full_like(m_s, _MASK_VALUE)
        l_s[...] = jnp.zeros_like(l_s)
        acc_s[...] = jnp.zeros_like(acc_s)

    q_start = qi * TQ
    k_start = ki * TK

    # ---- kv step: skip tiles entirely above the causal diagonal ----
    @pl.when(k_start <= q_start + (TQ - 1))
    def _():
        # Project k and v for this kv tile (fused c_attn, bf16 MXU, f32 acc).
        kv = jnp.dot(xkv_ref[0], wqkv_ref[:, C:],
                     preferred_element_type=jnp.float32) + bqkv_ref[:, C:]
        k = kv[:, :C].astype(jnp.bfloat16)          # (TK, C)
        v = kv[:, C:].astype(jnp.bfloat16)          # (TK, C)

        row = q_start + jax.lax.broadcasted_iota(jnp.int32, (TQ, TK), 0)
        col = k_start + jax.lax.broadcasted_iota(jnp.int32, (TQ, TK), 1)
        causal = col <= row                          # (TQ, TK)

        nt_dims = (((1,), (1,)), ((), ()))           # contract last dims: q @ k^T
        for h in range(H):                           # static unroll; heads = lane slices
            lo, hi = h * D, (h + 1) * D
            s = jax.lax.dot_general(q_s[:, lo:hi], k[:, lo:hi], nt_dims,
                                    preferred_element_type=jnp.float32)  # (TQ, TK)
            s = jnp.where(causal, s, _MASK_VALUE)

            m_prev = m_s[:, h:h + 1]                                     # (TQ, 1)
            m_new = jnp.maximum(m_prev, jnp.max(s, axis=-1, keepdims=True))
            alpha = jnp.exp(m_prev - m_new)
            p = jnp.exp(s - m_new)
            l_s[:, h:h + 1] = alpha * l_s[:, h:h + 1] + jnp.sum(
                p, axis=-1, keepdims=True)
            acc_s[:, lo:hi] = alpha * acc_s[:, lo:hi] + jnp.dot(
                p.astype(jnp.bfloat16), v[:, lo:hi],
                preferred_element_type=jnp.float32)
            m_s[:, h:h + 1] = m_new

    # ---- end of kv sweep: normalize and apply the output projection ----
    @pl.when(ki == nk - 1)
    def _():
        for h in range(H):
            lo, hi = h * D, (h + 1) * D
            acc_s[:, lo:hi] = acc_s[:, lo:hi] * pl.reciprocal(
                l_s[:, h:h + 1], approx=True)
        out = jnp.dot(acc_s[...].astype(jnp.bfloat16), wproj_ref[...],
                      preferred_element_type=jnp.float32) + bproj_ref[...]
        o_ref[0] = out.astype(o_ref.dtype)


def causal_self_attention(x, w_attn, b_attn, w_proj, b_proj, *, n_head,
                          q_tile=None, kv_tile=None):
    """x: (B,T,C) f32; w_attn: (C,3C); b_attn: (1,3C); w_proj: (C,C); b_proj: (1,C)."""
    B, T, C = x.shape
    assert C % n_head == 0
    D = C // n_head

    if q_tile is None:
        q_tile = min(T, 128)
    if kv_tile is None:
        kv_tile = min(T, 512)
    assert T % q_tile == 0 and T % kv_tile == 0
    nq, nk = T // q_tile, T // kv_tile

    # Fold the 1/sqrt(D) attention scale into the q slice of c_attn (free).
    scale = 1.0 / (D ** 0.5)
    w_attn = w_attn.at[:, :C].multiply(scale)
    b_attn = b_attn.at[:, :C].multiply(scale)

    # bf16 MXU operands (accumulation stays f32 inside the kernel).
    x_bf = x.astype(jnp.bfloat16)
    w_attn_bf = w_attn.astype(jnp.bfloat16)
    w_proj_bf = w_proj.astype(jnp.bfloat16)

    kernel = functools.partial(_attn_kernel, n_head=n_head)

    cost = pl.CostEstimate(
        flops=2 * B * T * C * 3 * C              # c_attn
        + 4 * B * n_head * T * T * D             # q@k^T and p@v
        + 2 * B * T * C * C,                     # c_proj
        transcendentals=B * n_head * T * T,
        bytes_accessed=2 * x_bf.size * 2
        + w_attn_bf.size * 2 + w_proj_bf.size * 2
        + (b_attn.size + b_proj.size) * 4
        + B * T * C * x.dtype.itemsize,
    )

    return pl.pallas_call(
        kernel,
        out_shape=jax.ShapeDtypeStruct((B, T, C), x.dtype),
        grid_spec=pltpu.PrefetchScalarGridSpec(
            num_scalar_prefetch=0,
            grid=(B, nq, nk),
            in_specs=[
                pl.BlockSpec((1, q_tile, C), lambda b, qi, ki: (b, qi, 0)),   # x rows -> q
                pl.BlockSpec((1, kv_tile, C), lambda b, qi, ki: (b, ki, 0)),  # x rows -> k,v
                pl.BlockSpec((C, 3 * C), lambda b, qi, ki: (0, 0)),           # c_attn W (resident)
                pl.BlockSpec((1, 3 * C), lambda b, qi, ki: (0, 0)),           # c_attn b
                pl.BlockSpec((C, C), lambda b, qi, ki: (0, 0)),               # c_proj W (resident)
                pl.BlockSpec((1, C), lambda b, qi, ki: (0, 0)),               # c_proj b
            ],
            out_specs=pl.BlockSpec((1, q_tile, C), lambda b, qi, ki: (b, qi, 0)),
            scratch_shapes=[
                pltpu.VMEM((q_tile, C), jnp.bfloat16),        # q tile (pre-scaled)
                pltpu.VMEM((q_tile, n_head), jnp.float32),    # running max m
                pltpu.VMEM((q_tile, n_head), jnp.float32),    # running sum l
                pltpu.VMEM((q_tile, C), jnp.float32),         # output accumulator
            ],
        ),
        compiler_params=pltpu.CompilerParams(
            dimension_semantics=("parallel", "parallel", "arbitrary"),
            vmem_limit_bytes=48 * 1024 * 1024),
        cost_estimate=cost,
    )(x_bf, x_bf, w_attn_bf, b_attn, w_proj_bf, b_proj)


def _reference(x, w_attn, b_attn, w_proj, b_proj, n_head):
    """Pure-JAX f32 reference mirroring the PyTorch forward."""
    B, T, C = x.shape
    D = C // n_head
    qkv = x @ w_attn + b_attn
    q, k, v = jnp.split(qkv, 3, axis=-1)

    def heads(t):
        return t.reshape(B, T, n_head, D).transpose(0, 2, 1, 3)

    q, k, v = heads(q), heads(k), heads(v)
    s = jnp.einsum('bhtd,bhsd->bhts', q, k) / jnp.sqrt(jnp.float32(D))
    mask = jnp.tril(jnp.ones((T, T), dtype=bool))
    s = jnp.where(mask[None, None], s, -jnp.inf)
    p = jax.nn.softmax(s, axis=-1)
    y = jnp.einsum('bhts,bhsd->bhtd', p, v)
    y = y.transpose(0, 2, 1, 3).reshape(B, T, C)
    return y @ w_proj + b_proj


if __name__ == "__main__":
    # Config: n_embd=32, n_head=4; input B=2, T=8 (block_size >= T).
    B, T, C, H = 2, 8, 32, 4

    key = jax.random.PRNGKey(0)
    kx, k1, k2, k3, k4 = jax.random.split(key, 5)

    x = jax.random.normal(kx, (B, T, C), dtype=jnp.float32)

    # nn.Linear-style deterministic init, weights stored as (in, out).
    bound = 1.0 / jnp.sqrt(jnp.float32(C))
    w_attn = jax.random.uniform(k1, (C, 3 * C), jnp.float32, -bound, bound)
    b_attn = jax.random.uniform(k2, (1, 3 * C), jnp.float32, -bound, bound)
    w_proj = jax.random.uniform(k3, (C, C), jnp.float32, -bound, bound)
    b_proj = jax.random.uniform(k4, (1, C), jnp.float32, -bound, bound)

    out = causal_self_attention(x, w_attn, b_attn, w_proj, b_proj, n_head=H)
    out = jax.block_until_ready(out)

    ref = _reference(x, w_attn, b_attn, w_proj, b_proj, H)
    assert out.shape == (B, T, C)
    # bf16 MXU operands (f32 accumulation) -> compare vs the f32 reference with
    # a bf16-appropriate tolerance.
    assert jnp.allclose(out, ref, atol=3e-2, rtol=3e-2), "mismatch vs reference"

    print("KERNEL_OK")
</pallas_src>

<mosaic_0001>
module attributes {stable_mosaic.version = 11 : i64} {
  func.func @_attn_kernel(%arg0: i32, %arg1: i32, %arg2: i32, %arg3: memref<1x8x32xbf16, #tpu.memory_space<vmem>>, %arg4: memref<1x8x32xbf16, #tpu.memory_space<vmem>>, %arg5: memref<32x96xbf16, #tpu.memory_space<vmem>>, %arg6: memref<1x96xf32, #tpu.memory_space<vmem>>, %arg7: memref<32x32xbf16, #tpu.memory_space<vmem>>, %arg8: memref<1x32xf32, #tpu.memory_space<vmem>>, %arg9: memref<1x8x32xf32, #tpu.memory_space<vmem>>, %arg10: memref<8x32xbf16, #tpu.memory_space<vmem>>, %arg11: memref<8x4xf32, #tpu.memory_space<vmem>>, %arg12: memref<8x4xf32, #tpu.memory_space<vmem>>, %arg13: memref<8x32xf32, #tpu.memory_space<vmem>>) attributes {dimension_semantics = [#tpu.dimension_semantics<parallel>, #tpu.dimension_semantics<parallel>, #tpu.dimension_semantics<arbitrary>], iteration_bounds = array<i64: 2, 1, 1>, scalar_prefetch = 0 : i64, scratch_operands = 4 : i64, tpu.core_type = #tpu.core_type<tc>, window_params = [{transform_indices = @transform_0, window_bounds = array<i64: 1, 8, 32>}, {transform_indices = @transform_1, window_bounds = array<i64: 1, 8, 32>}, {pipeline_mode = #tpu.pipeline_mode<synchronous>, transform_indices = @transform_2, window_bounds = array<i64: 32, 96>}, {pipeline_mode = #tpu.pipeline_mode<synchronous>, transform_indices = @transform_3, window_bounds = array<i64: 1, 96>}, {pipeline_mode = #tpu.pipeline_mode<synchronous>, transform_indices = @transform_4, window_bounds = array<i64: 32, 32>}, {pipeline_mode = #tpu.pipeline_mode<synchronous>, transform_indices = @transform_5, window_bounds = array<i64: 1, 32>}, {transform_indices = @transform_6, window_bounds = array<i64: 1, 8, 32>}]} {
    %c0_i32 = arith.constant 0 : i32
    %0 = arith.cmpi eq, %arg2, %c0_i32 : i32
    %1 = arith.extui %0 : i1 to i32
    %c0_i32_0 = arith.constant 0 : i32
    %2 = arith.cmpi ne, %1, %c0_i32_0 : i32
    scf.if %2 {
      %c0 = arith.constant 0 : index
      %c0_5 = arith.constant 0 : index
      %c0_6 = arith.constant 0 : index
      %12 = vector.load %arg3[%c0, %c0_5, %c0_6] : memref<1x8x32xbf16, #tpu.memory_space<vmem>>, vector<1x8x32xbf16>
      %13 = vector.shape_cast %12 : vector<1x8x32xbf16> to vector<8x32xbf16>
      %c0_7 = arith.constant 0 : index
      %c0_8 = arith.constant 0 : index
      %14 = vector.load %arg5[%c0_7, %c0_8] : memref<32x96xbf16, #tpu.memory_space<vmem>>, vector<32x32xbf16>
      %cst = arith.constant dense<0.000000e+00> : vector<8x32xf32>
      %15 = tpu.matmul %13, %14, %cst {dimension_numbers = #tpu.dot_dimension_numbers<[1], [0], [0], [1], [0, 0, 1, 1], [], []>} : vector<8x32xbf16>, vector<32x32xbf16>, vector<8x32xf32> -> vector<8x32xf32>
      %c0_9 = arith.constant 0 : index
      %c0_10 = arith.constant 0 : index
      %16 = vector.load %arg6[%c0_9, %c0_10] : memref<1x96xf32, #tpu.memory_space<vmem>>, vector<1x32xf32>
      %17 = vector.broadcast %16 : vector<1x32xf32> to vector<8x32xf32>
      %18 = arith.addf %15, %17 : vector<8x32xf32>
      %19 = arith.truncf %18 : vector<8x32xf32> to vector<8x32xbf16>
      %c0_11 = arith.constant 0 : index
      %c0_12 = arith.constant 0 : index
      %20 = vector.load %arg10[%c0_11, %c0_12] : memref<8x32xbf16, #tpu.memory_space<vmem>>, vector<8x32xbf16>
      tpu.vector_store %arg10[%c0_11, %c0_12], %19 {strides = array<i32>} : memref<8x32xbf16, #tpu.memory_space<vmem>>, vector<8x32xbf16>,
      %cst_13 = arith.constant -1.000000e+30 : f32
      %21 = vector.broadcast %cst_13 : f32 to vector<8x4xf32>
      %c0_14 = arith.constant 0 : index
      %c0_15 = arith.constant 0 : index
      %22 = vector.load %arg11[%c0_14, %c0_15] : memref<8x4xf32, #tpu.memory_space<vmem>>, vector<8x4xf32>
      tpu.vector_store %arg11[%c0_14, %c0_15], %21 {strides = array<i32>} : memref<8x4xf32, #tpu.memory_space<vmem>>, vector<8x4xf32>,
      %cst_16 = arith.constant 0.000000e+00 : f32
      %23 = vector.broadcast %cst_16 : f32 to vector<8x4xf32>
      %c0_17 = arith.constant 0 : index
      %c0_18 = arith.constant 0 : index
      %24 = vector.load %arg12[%c0_17, %c0_18] : memref<8x4xf32, #tpu.memory_space<vmem>>, vector<8x4xf32>
      tpu.vector_store %arg12[%c0_17, %c0_18], %23 {strides = array<i32>} : memref<8x4xf32, #tpu.memory_space<vmem>>, vector<8x4xf32>,
      %cst_19 = arith.constant 0.000000e+00 : f32
      %25 = vector.broadcast %cst_19 : f32 to vector<8x32xf32>
      %c0_20 = arith.constant 0 : index
      %c0_21 = arith.constant 0 : index
      %26 = vector.load %arg13[%c0_20, %c0_21] : memref<8x32xf32, #tpu.memory_space<vmem>>, vector<8x32xf32>
      tpu.vector_store %arg13[%c0_20, %c0_21], %25 {strides = array<i32>} : memref<8x32xf32, #tpu.memory_space<vmem>>, vector<8x32xf32>,
    } else {
    }
    %c8_i32 = arith.constant 8 : i32
    %3 = arith.muli %arg1, %c8_i32 : i32
    %c8_i32_1 = arith.constant 8 : i32
    %4 = arith.muli %arg2, %c8_i32_1 : i32
    %c7_i32 = arith.constant 7 : i32
    %5 = arith.addi %3, %c7_i32 : i32
    %6 = arith.cmpi sle, %4, %5 : i32
    %7 = arith.extui %6 : i1 to i32
    %c0_i32_2 = arith.constant 0 : i32
    %8 = arith.cmpi ne, %7, %c0_i32_2 : i32
    scf.if %8 {
      %c0 = arith.constant 0 : index
      %c0_5 = arith.constant 0 : index
      %c0_6 = arith.constant 0 : index
      %12 = vector.load %arg4[%c0, %c0_5, %c0_6] : memref<1x8x32xbf16, #tpu.memory_space<vmem>>, vector<1x8x32xbf16>
      %13 = vector.shape_cast %12 : vector<1x8x32xbf16> to vector<8x32xbf16>
      %c0_7 = arith.constant 0 : index
      %c32 = arith.constant 32 : index
      %14 = vector.load %arg5[%c0_7, %c32] : memref<32x96xbf16, #tpu.memory_space<vmem>>, vector<32x64xbf16>
      %cst = arith.constant dense<0.000000e+00> : vector<8x64xf32>
      %15 = tpu.matmul %13, %14, %cst {dimension_numbers = #tpu.dot_dimension_numbers<[1], [0], [0], [1], [0, 0, 1, 1], [], []>} : vector<8x32xbf16>, vector<32x64xbf16>, vector<8x64xf32> -> vector<8x64xf32>
      %c0_8 = arith.constant 0 : index
      %c32_9 = arith.constant 32 : index
      %16 = vector.load %arg6[%c0_8, %c32_9] : memref<1x96xf32, #tpu.memory_space<vmem>>, vector<1x64xf32>
      %17 = vector.broadcast %16 : vector<1x64xf32> to vector<8x64xf32>
      %18 = arith.addf %15, %17 : vector<8x64xf32>
      %19 = vector.extract_strided_slice %18 {offsets = [0, 0], sizes = [8, 32], strides = [1, 1]} : vector<8x64xf32> to vector<8x32xf32>
      %20 = arith.truncf %19 : vector<8x32xf32> to vector<8x32xbf16>
      %21 = vector.extract_strided_slice %18 {offsets = [0, 32], sizes = [8, 32], strides = [1, 1]} : vector<8x64xf32> to vector<8x32xf32>
      %22 = arith.truncf %21 : vector<8x32xf32> to vector<8x32xbf16>
      %23 = tpu.iota {dimensions = array<i32: 0>} : vector<8x8xi32>
      %24 = vector.broadcast %3 : i32 to vector<8x8xi32>
      %25 = arith.addi %24, %23 : vector<8x8xi32>
      %26 = tpu.iota {dimensions = array<i32: 1>} : vector<8x8xi32>
      %27 = vector.broadcast %4 : i32 to vector<8x8xi32>
      %28 = arith.addi %27, %26 : vector<8x8xi32>
      %29 = arith.cmpi sle, %28, %25 : vector<8x8xi32>
      %c0_10 = arith.constant 0 : index
      %c0_11 = arith.constant 0 : index
      %30 = vector.load %arg10[%c0_10, %c0_11] : memref<8x32xbf16, #tpu.memory_space<vmem>>, vector<8x8xbf16>
      %31 = vector.extract_strided_slice %20 {offsets = [0, 0], sizes = [8, 8], strides = [1, 1]} : vector<8x32xbf16> to vector<8x8xbf16>
      %cst_12 = arith.constant dense<0.000000e+00> : vector<8x8xf32>
      %32 = tpu.matmul %30, %31, %cst_12 {dimension_numbers = #tpu.dot_dimension_numbers<[1], [1], [0], [0], [0, 0, 1, 0], [], []>} : vector<8x8xbf16>, vector<8x8xbf16>, vector<8x8xf32> -> vector<8x8xf32>
      %cst_13 = arith.constant -1.000000e+30 : f32
      %33 = vector.broadcast %cst_13 : f32 to vector<8x8xf32>
      %34 = arith.select %29, %32, %33 : vector<8x8xi1>, vector<8x8xf32>
      %c0_14 = arith.constant 0 : index
      %c0_15 = arith.constant 0 : index
      %35 = vector.load %arg11[%c0_14, %c0_15] : memref<8x4xf32, #tpu.memory_space<vmem>>, vector<8x1xf32>
      %cst_16 = arith.constant dense<0xFF800000> : vector<8xf32>
      %36 = vector.multi_reduction <maximumf>, %34, %cst_16 [1] : vector<8x8xf32> to vector<8xf32>
      %37 = vector.shape_cast %36 : vector<8xf32> to vector<8x1xf32>
      %38 = arith.maximumf %35, %37 : vector<8x1xf32>
      %39 = arith.subf %35, %38 : vector<8x1xf32>
      %40 = math.exp %39 : vector<8x1xf32>
      %41 = vector.broadcast %38 : vector<8x1xf32> to vector<8x8xf32>
      %42 = arith.subf %34, %41 : vector<8x8xf32>
      %43 = math.exp %42 : vector<8x8xf32>
      %c0_17 = arith.constant 0 : index
      %c0_18 = arith.constant 0 : index
      %44 = vector.load %arg12[%c0_17, %c0_18] : memref<8x4xf32, #tpu.memory_space<vmem>>, vector<8x1xf32>
      %45 = arith.mulf %40, %44 : vector<8x1xf32>
      %cst_19 = arith.constant dense<0.000000e+00> : vector<8xf32>
      %46 = vector.multi_reduction <add>, %43, %cst_19 [1] : vector<8x8xf32> to vector<8xf32>
      %47 = vector.shape_cast %46 : vector<8xf32> to vector<8x1xf32>
      %48 = arith.addf %45, %47 : vector<8x1xf32>
      %c0_20 = arith.constant 0 : index
      %c0_21 = arith.constant 0 : index
      %49 = vector.load %arg12[%c0_20, %c0_21] : memref<8x4xf32, #tpu.memory_space<vmem>>, vector<8x1xf32>
      tpu.vector_store %arg12[%c0_20, %c0_21], %48 {strides = array<i32>} : memref<8x4xf32, #tpu.memory_space<vmem>>, vector<8x1xf32>,
      %c0_22 = arith.constant 0 : index
      %c0_23 = arith.constant 0 : index
      %50 = vector.load %arg13[%c0_22, %c0_23] : memref<8x32xf32, #tpu.memory_space<vmem>>, vector<8x8xf32>
      %51 = vector.broadcast %40 : vector<8x1xf32> to vector<8x8xf32>
      %52 = arith.mulf %51, %50 : vector<8x8xf32>
      %53 = arith.truncf %43 : vector<8x8xf32> to vector<8x8xbf16>
      %54 = vector.extract_strided_slice %22 {offsets = [0, 0], sizes = [8, 8], strides = [1, 1]} : vector<8x32xbf16> to vector<8x8xbf16>
      %cst_24 = arith.constant dense<0.000000e+00> : vector<8x8xf32>
      %55 = tpu.matmul %53, %54, %cst_24 {dimension_numbers = #tpu.dot_dimension_numbers<[1], [0], [0], [1], [0, 0, 1, 1], [], []>} : vector<8x8xbf16>, vector<8x8xbf16>, vector<8x8xf32> -> vector<8x8xf32>
      %56 = arith.addf %52, %55 : vector<8x8xf32>
      %c0_25 = arith.constant 0 : index
      %c0_26 = arith.constant 0 : index
      %57 = vector.load %arg13[%c0_25, %c0_26] : memref<8x32xf32, #tpu.memory_space<vmem>>, vector<8x8xf32>
      tpu.vector_store %arg13[%c0_25, %c0_26], %56 {strides = array<i32>} : memref<8x32xf32, #tpu.memory_space<vmem>>, vector<8x8xf32>,
      %c0_27 = arith.constant 0 : index
      %c0_28 = arith.constant 0 : index
      %58 = vector.load %arg11[%c0_27, %c0_28] : memref<8x4xf32, #tpu.memory_space<vmem>>, vector<8x1xf32>
      tpu.vector_store %arg11[%c0_27, %c0_28], %38 {strides = array<i32>} : memref<8x4xf32, #tpu.memory_space<vmem>>, vector<8x1xf32>,
      %c0_29 = arith.constant 0 : index
      %c8 = arith.constant 8 : index
      %59 = vector.load %arg10[%c0_29, %c8] : memref<8x32xbf16, #tpu.memory_space<vmem>>, vector<8x8xbf16>
      %60 = vector.extract_strided_slice %20 {offsets = [0, 8], sizes = [8, 8], strides = [1, 1]} : vector<8x32xbf16> to vector<8x8xbf16>
      %cst_30 = arith.constant dense<0.000000e+00> : vector<8x8xf32>
      %61 = tpu.matmul %59, %60, %cst_30 {dimension_numbers = #tpu.dot_dimension_numbers<[1], [1], [0], [0], [0, 0, 1, 0], [], []>} : vector<8x8xbf16>, vector<8x8xbf16>, vector<8x8xf32> -> vector<8x8xf32>
      %cst_31 = arith.constant -1.000000e+30 : f32
      %62 = vector.broadcast %cst_31 : f32 to vector<8x8xf32>
      %63 = arith.select %29, %61, %62 : vector<8x8xi1>, vector<8x8xf32>
      %c0_32 = arith.constant 0 : index
      %c1 = arith.constant 1 : index
      %64 = vector.load %arg11[%c0_32, %c1] : memref<8x4xf32, #tpu.memory_space<vmem>>, vector<8x1xf32>
      %cst_33 = arith.constant dense<0xFF800000> : vector<8xf32>
      %65 = vector.multi_reduction <maximumf>, %63, %cst_33 [1] : vector<8x8xf32> to vector<8xf32>
      %66 = vector.shape_cast %65 : vector<8xf32> to vector<8x1xf32>
      %67 = arith.maximumf %64, %66 : vector<8x1xf32>
      %68 = arith.subf %64, %67 : vector<8x1xf32>
      %69 = math.exp %68 : vector<8x1xf32>
      %70 = vector.broadcast %67 : vector<8x1xf32> to vector<8x8xf32>
      %71 = arith.subf %63, %70 : vector<8x8xf32>
      %72 = math.exp %71 : vector<8x8xf32>
      %c0_34 = arith.constant 0 : index
      %c1_35 = arith.constant 1 : index
      %73 = vector.load %arg12[%c0_34, %c1_35] : memref<8x4xf32, #tpu.memory_space<vmem>>, vector<8x1xf32>
      %74 = arith.mulf %69, %73 : vector<8x1xf32>
      %cst_36 = arith.constant dense<0.000000e+00> : vector<8xf32>
      %75 = vector.multi_reduction <add>, %72, %cst_36 [1] : vector<8x8xf32> to vector<8xf32>
      %76 = vector.shape_cast %75 : vector<8xf32> to vector<8x1xf32>
      %77 = arith.addf %74, %76 : vector<8x1xf32>
      %c0_37 = arith.constant 0 : index
      %c1_38 = arith.constant 1 : index
      %78 = vector.load %arg12[%c0_37, %c1_38] : memref<8x4xf32, #tpu.memory_space<vmem>>, vector<8x1xf32>
      tpu.vector_store %arg12[%c0_37, %c1_38], %77 {strides = array<i32>} : memref<8x4xf32, #tpu.memory_space<vmem>>, vector<8x1xf32>,
      %c0_39 = arith.constant 0 : index
      %c8_40 = arith.constant 8 : index
      %79 = vector.load %arg13[%c0_39, %c8_40] : memref<8x32xf32, #tpu.memory_space<vmem>>, vector<8x8xf32>
      %80 = vector.broadcast %69 : vector<8x1xf32> to vector<8x8xf32>
      %81 = arith.mulf %80, %79 : vector<8x8xf32>
      %82 = arith.truncf %72 : vector<8x8xf32> to vector<8x8xbf16>
      %83 = vector.extract_strided_slice %22 {offsets = [0, 8], sizes = [8, 8], strides = [1, 1]} : vector<8x32xbf16> to vector<8x8xbf16>
      %cst_41 = arith.constant dense<0.000000e+00> : vector<8x8xf32>
      %84 = tpu.matmul %82, %83, %cst_41 {dimension_numbers = #tpu.dot_dimension_numbers<[1], [0], [0], [1], [0, 0, 1, 1], [], []>} : vector<8x8xbf16>, vector<8x8xbf16>, vector<8x8xf32> -> vector<8x8xf32>
      %85 = arith.addf %81, %84 : vector<8x8xf32>
      %c0_42 = arith.constant 0 : index
      %c8_43 = arith.constant 8 : index
      %86 = vector.load %arg13[%c0_42, %c8_43] : memref<8x32xf32, #tpu.memory_space<vmem>>, vector<8x8xf32>
      tpu.vector_store %arg13[%c0_42, %c8_43], %85 {strides = array<i32>} : memref<8x32xf32, #tpu.memory_space<vmem>>, vector<8x8xf32>,
      %c0_44 = arith.constant 0 : index
      %c1_45 = arith.constant 1 : index
      %87 = vector.load %arg11[%c0_44, %c1_45] : memref<8x4xf32, #tpu.memory_space<vmem>>, vector<8x1xf32>
      tpu.vector_store %arg11[%c0_44, %c1_45], %67 {strides = array<i32>} : memref<8x4xf32, #tpu.memory_space<vmem>>, vector<8x1xf32>,
      %c0_46 = arith.constant 0 : index
      %c16 = arith.constant 16 : index
      %88 = vector.load %arg10[%c0_46, %c16] : memref<8x32xbf16, #tpu.memory_space<vmem>>, vector<8x8xbf16>
      %89 = vector.extract_strided_slice %20 {offsets = [0, 16], sizes = [8, 8], strides = [1, 1]} : vector<8x32xbf16> to vector<8x8xbf16>
      %cst_47 = arith.constant dense<0.000000e+00> : vector<8x8xf32>
      %90 = tpu.matmul %88, %89, %cst_47 {dimension_numbers = #tpu.dot_dimension_numbers<[1], [1], [0], [0], [0, 0, 1, 0], [], []>} : vector<8x8xbf16>, vector<8x8xbf16>, vector<8x8xf32> -> vector<8x8xf32>
      %cst_48 = arith.constant -1.000000e+30 : f32
      %91 = vector.broadcast %cst_48 : f32 to vector<8x8xf32>
      %92 = arith.select %29, %90, %91 : vector<8x8xi1>, vector<8x8xf32>
      %c0_49 = arith.constant 0 : index
      %c2 = arith.constant 2 : index
      %93 = vector.load %arg11[%c0_49, %c2] : memref<8x4xf32, #tpu.memory_space<vmem>>, vector<8x1xf32>
      %cst_50 = arith.constant dense<0xFF800000> : vector<8xf32>
      %94 = vector.multi_reduction <maximumf>, %92, %cst_50 [1] : vector<8x8xf32> to vector<8xf32>
      %95 = vector.shape_cast %94 : vector<8xf32> to vector<8x1xf32>
      %96 = arith.maximumf %93, %95 : vector<8x1xf32>
      %97 = arith.subf %93, %96 : vector<8x1xf32>
      %98 = math.exp %97 : vector<8x1xf32>
      %99 = vector.broadcast %96 : vector<8x1xf32> to vector<8x8xf32>
      %100 = arith.subf %92, %99 : vector<8x8xf32>
      %101 = math.exp %100 : vector<8x8xf32>
      %c0_51 = arith.constant 0 : index
      %c2_52 = arith.constant 2 : index
      %102 = vector.load %arg12[%c0_51, %c2_52] : memref<8x4xf32, #tpu.memory_space<vmem>>, vector<8x1xf32>
      %103 = arith.mulf %98, %102 : vector<8x1xf32>
      %cst_53 = arith.constant dense<0.000000e+00> : vector<8xf32>
      %104 = vector.multi_reduction <add>, %101, %cst_53 [1] : vector<8x8xf32> to vector<8xf32>
      %105 = vector.shape_cast %104 : vector<8xf32> to vector<8x1xf32>
      %106 = arith.addf %103, %105 : vector<8x1xf32>
      %c0_54 = arith.constant 0 : index
      %c2_55 = arith.constant 2 : index
      %107 = vector.load %arg12[%c0_54, %c2_55] : memref<8x4xf32, #tpu.memory_space<vmem>>, vector<8x1xf32>
      tpu.vector_store %arg12[%c0_54, %c2_55], %106 {strides = array<i32>} : memref<8x4xf32, #tpu.memory_space<vmem>>, vector<8x1xf32>,
      %c0_56 = arith.constant 0 : index
      %c16_57 = arith.constant 16 : index
      %108 = vector.load %arg13[%c0_56, %c16_57] : memref<8x32xf32, #tpu.memory_space<vmem>>, vector<8x8xf32>
      %109 = vector.broadcast %98 : vector<8x1xf32> to vector<8x8xf32>
      %110 = arith.mulf %109, %108 : vector<8x8xf32>
      %111 = arith.truncf %101 : vector<8x8xf32> to vector<8x8xbf16>
      %112 = vector.extract_strided_slice %22 {offsets = [0, 16], sizes = [8, 8], strides = [1, 1]} : vector<8x32xbf16> to vector<8x8xbf16>
      %cst_58 = arith.constant dense<0.000000e+00> : vector<8x8xf32>
      %113 = tpu.matmul %111, %112, %cst_58 {dimension_numbers = #tpu.dot_dimension_numbers<[1], [0], [0], [1], [0, 0, 1, 1], [], []>} : vector<8x8xbf16>, vector<8x8xbf16>, vector<8x8xf32> -> vector<8x8xf32>
      %114 = arith.addf %110, %113 : vector<8x8xf32>
      %c0_59 = arith.constant 0 : index
      %c16_60 = arith.constant 16 : index
      %115 = vector.load %arg13[%c0_59, %c16_60] : memref<8x32xf32, #tpu.memory_space<vmem>>, vector<8x8xf32>
      tpu.vector_store %arg13[%c0_59, %c16_60], %114 {strides = array<i32>} : memref<8x32xf32, #tpu.memory_space<vmem>>, vector<8x8xf32>,
      %c0_61 = arith.constant 0 : index
      %c2_62 = arith.constant 2 : index
      %116 = vector.load %arg11[%c0_61, %c2_62] : memref<8x4xf32, #tpu.memory_space<vmem>>, vector<8x1xf32>
      tpu.vector_store %arg11[%c0_61, %c2_62], %96 {strides = array<i32>} : memref<8x4xf32, #tpu.memory_space<vmem>>, vector<8x1xf32>,
      %c0_63 = arith.constant 0 : index
      %c24 = arith.constant 24 : index
      %117 = vector.load %arg10[%c0_63, %c24] : memref<8x32xbf16, #tpu.memory_space<vmem>>, vector<8x8xbf16>
      %118 = vector.extract_strided_slice %20 {offsets = [0, 24], sizes = [8, 8], strides = [1, 1]} : vector<8x32xbf16> to vector<8x8xbf16>
      %cst_64 = arith.constant dense<0.000000e+00> : vector<8x8xf32>
      %119 = tpu.matmul %117, %118, %cst_64 {dimension_numbers = #tpu.dot_dimension_numbers<[1], [1], [0], [0], [0, 0, 1, 0], [], []>} : vector<8x8xbf16>, vector<8x8xbf16>, vector<8x8xf32> -> vector<8x8xf32>
      %cst_65 = arith.constant -1.000000e+30 : f32
      %120 = vector.broadcast %cst_65 : f32 to vector<8x8xf32>
      %121 = arith.select %29, %119, %120 : vector<8x8xi1>, vector<8x8xf32>
      %c0_66 = arith.constant 0 : index
      %c3 = arith.constant 3 : index
      %122 = vector.load %arg11[%c0_66, %c3] : memref<8x4xf32, #tpu.memory_space<vmem>>, vector<8x1xf32>
      %cst_67 = arith.constant dense<0xFF800000> : vector<8xf32>
      %123 = vector.multi_reduction <maximumf>, %121, %cst_67 [1] : vector<8x8xf32> to vector<8xf32>
      %124 = vector.shape_cast %123 : vector<8xf32> to vector<8x1xf32>
      %125 = arith.maximumf %122, %124 : vector<8x1xf32>
      %126 = arith.subf %122, %125 : vector<8x1xf32>
      %127 = math.exp %126 : vector<8x1xf32>
      %128 = vector.broadcast %125 : vector<8x1xf32> to vector<8x8xf32>
      %129 = arith.subf %121, %128 : vector<8x8xf32>
      %130 = math.exp %129 : vector<8x8xf32>
      %c0_68 = arith.constant 0 : index
      %c3_69 = arith.constant 3 : index
      %131 = vector.load %arg12[%c0_68, %c3_69] : memref<8x4xf32, #tpu.memory_space<vmem>>, vector<8x1xf32>
      %132 = arith.mulf %127, %131 : vector<8x1xf32>
      %cst_70 = arith.constant dense<0.000000e+00> : vector<8xf32>
      %133 = vector.multi_reduction <add>, %130, %cst_70 [1] : vector<8x8xf32> to vector<8xf32>
      %134 = vector.shape_cast %133 : vector<8xf32> to vector<8x1xf32>
      %135 = arith.addf %132, %134 : vector<8x1xf32>
      %c0_71 = arith.constant 0 : index
      %c3_72 = arith.constant 3 : index
      %136 = vector.load %arg12[%c0_71, %c3_72] : memref<8x4xf32, #tpu.memory_space<vmem>>, vector<8x1xf32>
      tpu.vector_store %arg12[%c0_71, %c3_72], %135 {strides = array<i32>} : memref<8x4xf32, #tpu.memory_space<vmem>>, vector<8x1xf32>,
      %c0_73 = arith.constant 0 : index
      %c24_74 = arith.constant 24 : index
      %137 = vector.load %arg13[%c0_73, %c24_74] : memref<8x32xf32, #tpu.memory_space<vmem>>, vector<8x8xf32>
      %138 = vector.broadcast %127 : vector<8x1xf32> to vector<8x8xf32>
      %139 = arith.mulf %138, %137 : vector<8x8xf32>
      %140 = arith.truncf %130 : vector<8x8xf32> to vector<8x8xbf16>
      %141 = vector.extract_strided_slice %22 {offsets = [0, 24], sizes = [8, 8], strides = [1, 1]} : vector<8x32xbf16> to vector<8x8xbf16>
      %cst_75 = arith.constant dense<0.000000e+00> : vector<8x8xf32>
      %142 = tpu.matmul %140, %141, %cst_75 {dimension_numbers = #tpu.dot_dimension_numbers<[1], [0], [0], [1], [0, 0, 1, 1], [], []>} : vector<8x8xbf16>, vector<8x8xbf16>, vector<8x8xf32> -> vector<8x8xf32>
      %143 = arith.addf %139, %142 : vector<8x8xf32>
      %c0_76 = arith.constant 0 : index
      %c24_77 = arith.constant 24 : index
      %144 = vector.load %arg13[%c0_76, %c24_77] : memref<8x32xf32, #tpu.memory_space<vmem>>, vector<8x8xf32>
      tpu.vector_store %arg13[%c0_76, %c24_77], %143 {strides = array<i32>} : memref<8x32xf32, #tpu.memory_space<vmem>>, vector<8x8xf32>,
      %c0_78 = arith.constant 0 : index
      %c3_79 = arith.constant 3 : index
      %145 = vector.load %arg11[%c0_78, %c3_79] : memref<8x4xf32, #tpu.memory_space<vmem>>, vector<8x1xf32>
      tpu.vector_store %arg11[%c0_78, %c3_79], %125 {strides = array<i32>} : memref<8x4xf32, #tpu.memory_space<vmem>>, vector<8x1xf32>,
    } else {
    }
    %c0_i32_3 = arith.constant 0 : i32
    %9 = arith.cmpi eq, %arg2, %c0_i32_3 : i32
    %10 = arith.extui %9 : i1 to i32
    %c0_i32_4 = arith.constant 0 : i32
    %11 = arith.cmpi ne, %10, %c0_i32_4 : i32
    scf.if %11 {
      %c0 = arith.constant 0 : index
      %c0_5 = arith.constant 0 : index
      %12 = vector.load %arg13[%c0, %c0_5] : memref<8x32xf32, #tpu.memory_space<vmem>>, vector<8x8xf32>
      %c0_6 = arith.constant 0 : index
      %c0_7 = arith.constant 0 : index
      %13 = vector.load %arg12[%c0_6, %c0_7] : memref<8x4xf32, #tpu.memory_space<vmem>>, vector<8x1xf32>
      %14 = tpu.reciprocal %13 {approx = true} : vector<8x1xf32> -> vector<8x1xf32>
      %15 = vector.broadcast %14 : vector<8x1xf32> to vector<8x8xf32>
      %16 = arith.mulf %12, %15 : vector<8x8xf32>
      %c0_8 = arith.constant 0 : index
      %c0_9 = arith.constant 0 : index
      %17 = vector.load %arg13[%c0_8, %c0_9] : memref<8x32xf32, #tpu.memory_space<vmem>>, vector<8x8xf32>
      tpu.vector_store %arg13[%c0_8, %c0_9], %16 {strides = array<i32>} : memref<8x32xf32, #tpu.memory_space<vmem>>, vector<8x8xf32>,
      %c0_10 = arith.constant 0 : index
      %c8 = arith.constant 8 : index
      %18 = vector.load %arg13[%c0_10, %c8] : memref<8x32xf32, #tpu.memory_space<vmem>>, vector<8x8xf32>
      %c0_11 = arith.constant 0 : index
      %c1 = arith.constant 1 : index
      %19 = vector.load %arg12[%c0_11, %c1] : memref<8x4xf32, #tpu.memory_space<vmem>>, vector<8x1xf32>
      %20 = tpu.reciprocal %19 {approx = true} : vector<8x1xf32> -> vector<8x1xf32>
      %21 = vector.broadcast %20 : vector<8x1xf32> to vector<8x8xf32>
      %22 = arith.mulf %18, %21 : vector<8x8xf32>
      %c0_12 = arith.constant 0 : index
      %c8_13 = arith.constant 8 : index
      %23 = vector.load %arg13[%c0_12, %c8_13] : memref<8x32xf32, #tpu.memory_space<vmem>>, vector<8x8xf32>
      tpu.vector_store %arg13[%c0_12, %c8_13], %22 {strides = array<i32>} : memref<8x32xf32, #tpu.memory_space<vmem>>, vector<8x8xf32>,
      %c0_14 = arith.constant 0 : index
      %c16 = arith.constant 16 : index
      %24 = vector.load %arg13[%c0_14, %c16] : memref<8x32xf32, #tpu.memory_space<vmem>>, vector<8x8xf32>
      %c0_15 = arith.constant 0 : index
      %c2 = arith.constant 2 : index
      %25 = vector.load %arg12[%c0_15, %c2] : memref<8x4xf32, #tpu.memory_space<vmem>>, vector<8x1xf32>
      %26 = tpu.reciprocal %25 {approx = true} : vector<8x1xf32> -> vector<8x1xf32>
      %27 = vector.broadcast %26 : vector<8x1xf32> to vector<8x8xf32>
      %28 = arith.mulf %24, %27 : vector<8x8xf32>
      %c0_16 = arith.constant 0 : index
      %c16_17 = arith.constant 16 : index
      %29 = vector.load %arg13[%c0_16, %c16_17] : memref<8x32xf32, #tpu.memory_space<vmem>>, vector<8x8xf32>
      tpu.vector_store %arg13[%c0_16, %c16_17], %28 {strides = array<i32>} : memref<8x32xf32, #tpu.memory_space<vmem>>, vector<8x8xf32>,
      %c0_18 = arith.constant 0 : index
      %c24 = arith.constant 24 : index
      %30 = vector.load %arg13[%c0_18, %c24] : memref<8x32xf32, #tpu.memory_space<vmem>>, vector<8x8xf32>
      %c0_19 = arith.constant 0 : index
      %c3 = arith.constant 3 : index
      %31 = vector.load %arg12[%c0_19, %c3] : memref<8x4xf32, #tpu.memory_space<vmem>>, vector<8x1xf32>
      %32 = tpu.reciprocal %31 {approx = true} : vector<8x1xf32> -> vector<8x1xf32>
      %33 = vector.broadcast %32 : vector<8x1xf32> to vector<8x8xf32>
      %34 = arith.mulf %30, %33 : vector<8x8xf32>
      %c0_20 = arith.constant 0 : index
      %c24_21 = arith.constant 24 : index
      %35 = vector.load %arg13[%c0_20, %c24_21] : memref<8x32xf32, #tpu.memory_space<vmem>>, vector<8x8xf32>
      tpu.vector_store %arg13[%c0_20, %c24_21], %34 {strides = array<i32>} : memref<8x32xf32, #tpu.memory_space<vmem>>, vector<8x8xf32>,
      %c0_22 = arith.constant 0 : index
      %c0_23 = arith.constant 0 : index
      %36 = vector.load %arg13[%c0_22, %c0_23] : memref<8x32xf32, #tpu.memory_space<vmem>>, vector<8x32xf32>
      %37 = arith.truncf %36 : vector<8x32xf32> to vector<8x32xbf16>
      %c0_24 = arith.constant 0 : index
      %c0_25 = arith.constant 0 : index
      %38 = vector.load %arg7[%c0_24, %c0_25] : memref<32x32xbf16, #tpu.memory_space<vmem>>, vector<32x32xbf16>
      %cst = arith.constant dense<0.000000e+00> : vector<8x32xf32>
      %39 = tpu.matmul %37, %38, %cst {dimension_numbers = #tpu.dot_dimension_numbers<[1], [0], [0], [1], [0, 0, 1, 1], [], []>} : vector<8x32xbf16>, vector<32x32xbf16>, vector<8x32xf32> -> vector<8x32xf32>
      %c0_26 = arith.constant 0 : index
      %c0_27 = arith.constant 0 : index
      %40 = vector.load %arg8[%c0_26, %c0_27] : memref<1x32xf32, #tpu.memory_space<vmem>>, vector<1x32xf32>
      %41 = vector.broadcast %40 : vector<1x32xf32> to vector<8x32xf32>
      %42 = arith.addf %39, %41 : vector<8x32xf32>
      %c0_28 = arith.constant 0 : index
      %c0_29 = arith.constant 0 : index
      %c0_30 = arith.constant 0 : index
      %43 = vector.load %arg9[%c0_28, %c0_29, %c0_30] : memref<1x8x32xf32, #tpu.memory_space<vmem>>, vector<1x8x32xf32>
      %44 = vector.shape_cast %43 : vector<1x8x32xf32> to vector<8x32xf32>
      %45 = vector.shape_cast %42 : vector<8x32xf32> to vector<1x8x32xf32>
      tpu.vector_store %arg9[%c0_28, %c0_29, %c0_30], %45 {strides = array<i32>} : memref<1x8x32xf32, #tpu.memory_space<vmem>>, vector<1x8x32xf32>,
    } else {
    }
    return
  }
  func.func @transform_0(%arg0: i32, %arg1: i32, %arg2: i32) -> (i32, i32, i32) {
    %c0_i32 = arith.constant 0 : i32
    %c0_i32_0 = arith.constant 0 : i32
    return %arg0, %arg1, %c0_i32 : i32, i32, i32
  }
  func.func @transform_1(%arg0: i32, %arg1: i32, %arg2: i32) -> (i32, i32, i32) {
    %c0_i32 = arith.constant 0 : i32
    %c0_i32_0 = arith.constant 0 : i32
    return %arg0, %arg2, %c0_i32 : i32, i32, i32
  }
  func.func @transform_2(%arg0: i32, %arg1: i32, %arg2: i32) -> (i32, i32) {
    %c0_i32 = arith.constant 0 : i32
    %c0_i32_0 = arith.constant 0 : i32
    %c0_i32_1 = arith.constant 0 : i32
    return %c0_i32, %c0_i32_0 : i32, i32
  }
  func.func @transform_3(%arg0: i32, %arg1: i32, %arg2: i32) -> (i32, i32) {
    %c0_i32 = arith.constant 0 : i32
    %c0_i32_0 = arith.constant 0 : i32
    %c0_i32_1 = arith.constant 0 : i32
    return %c0_i32, %c0_i32_0 : i32, i32
  }
  func.func @transform_4(%arg0: i32, %arg1: i32, %arg2: i32) -> (i32, i32) {
    %c0_i32 = arith.constant 0 : i32
    %c0_i32_0 = arith.constant 0 : i32
    %c0_i32_1 = arith.constant 0 : i32
    return %c0_i32, %c0_i32_0 : i32, i32
  }
  func.func @transform_5(%arg0: i32, %arg1: i32, %arg2: i32) -> (i32, i32) {
    %c0_i32 = arith.constant 0 : i32
    %c0_i32_0 = arith.constant 0 : i32
    %c0_i32_1 = arith.constant 0 : i32
    return %c0_i32, %c0_i32_0 : i32, i32
  }
  func.func @transform_6(%arg0: i32, %arg1: i32, %arg2: i32) -> (i32, i32, i32) {
    %c0_i32 = arith.constant 0 : i32
    %c0_i32_0 = arith.constant 0 : i32
    return %arg0, %arg1, %c0_i32 : i32, i32, i32
  }
}

</mosaic_0001>

<bundles_post_ra>
// kernel: tpu_custom_call.1
= control target key start
LH: loop header
LB: loop body
LE: loop exit
PB: predicated region body
PF: predicated region fallthrough
CT: control target
= control target key end

     0   :  { %s2383_s0 = inlined_call_operand.hbm [shape: bf16[2,8,32], index: 0, kind: input, shape index: {}]   ;;  %s2384_s1 = inlined_call_operand.hbm [shape: bf16[2,8,32], index: 1, kind: input, shape index: {}]   ;;  %s2385_s2 = inlined_call_operand.hbm [shape: bf16[32,96], index: 2, kind: input, shape index: {}]   ;;  %s2386_s3 = inlined_call_operand.vmem [shape: f32[1,96], index: 3, kind: input, shape index: {}]   ;;  %s2387_s4 = inlined_call_operand.hbm [shape: bf16[32,32], index: 4, kind: input, shape index: {}]   ;;  %s2388_s5 = inlined_call_operand.vmem [shape: f32[1,32], index: 5, kind: input, shape index: {}]   ;;  %s2389_s6 = inlined_call_operand.hbm [shape: f32[2,8,32], index: 6, kind: output, shape index: {}]  }
   0x1   :  { %2396 = sst [smem:[#allocation23_spill]] %s2385_s2 }
   0x2   :  { %2397 = sst [smem:[#allocation24_spill]] %s2387_s4 }
   0x3   :  { %11 = vsyncpa [#allocation7], 0 }
   0x4   :  { %13 = vsyncpa [#allocation7 + $0x1], 0 }
   0x5   :  { %14 = vsyncpa [#allocation10], 0 }
   0x6   :  { %16 = vsyncpa [#allocation10 + $0x1], 0 }
   0x7   :  { %17 = vsyncpa [#allocation13], 0 }
   0x8   :  { %18 = vsyncpa [#allocation8], 0 }
   0x9   :  { %20 = vsyncpa [#allocation8 + $0x1], 0  ;;  %s1909_s21 = smov 0   ;;  %s1911_s22 = smov 0  }
   0xa   :  { %s1913_s23 = smov 0   ;;  %s1915_s24 = smov 0  }
   0xb   :  { %s1917_s25 = smov 0   ;;  %s1919_s26 = smov 0  }
   0xc LB: > { %2398 = sst [smem:[#allocation20_spill]] %s1844_s25  ;;  %s1940_s27 = sadd.s32 4294967295, %s1848_s26   ;;  %s1848_s26 = sphi %s1919_s26, %s26_s26   ;;  %s1844_s25 = sphi %s1917_s25, %s2421_s25   ;;  %s1840_s24 = sphi %s1915_s24, %s2420_s24   ;;  %s1836_s23 = sphi %s1913_s23, %s2424_s23   ;;  %s1832_s22 = sphi %s1911_s22, %s2423_s22   ;;  %s1828_s21 = sphi %s1909_s21, %s2422_s21  }
   0xd   : > { %s1353_s28 = sadd.s32 4294967294, %s1848_s26   ;;  %p67_p0 = scmp.ne.s32.totalorder %s1832_s22, %s1828_s21 }
   0xe   : > { %p2390_p1 = scmp.eq.s32.totalorder %s1940_s27, 0  ;;  %p211_p3 = scmp.eq.s32.totalorder %s1353_s28, 1 }
   0xf   : > { %p1354_p5 = scmp.ge.s32.totalorder %s1848_s26, 1  ;;  %p218_p7 = scmp.lt.s32.totalorder %s1848_s26, 3 }
  0x10   : > { %p1949_p4 = por %p2390_p1, %p67_p0  ;;  %p1954_p6 = por %p211_p3, %p67_p0 }
  0x11   : > { %p1959_p8 = pnand %p1354_p5, %p218_p7  ;;  %s1850_s8 = smov [#allocation11]  }
  0x12   : > { %s2399_s29 = scalar_select %p1949_p4, 1, 0 }
  0x13   : > { %s2400_s30 = scalar_select %p1954_p6, 1, 0 }
  0x14   : > { %s2401_s7 = scalar_select %p1959_p8, 1, 0 }
  0x15   : > { %s230_s9 = sshll.u32 %s1850_s8, 4  ;;  %p1506_p9 = pneg %p1959_p8  ;;  %s1963_s9 = int_to_ptr.vmem [resolvable:$true] %s230_s9 }
  0x16   : > { %s1851_s11 = smov [#allocation12]   ;;  %s2403_s2 = sld [smem:[#allocation23_spill]] }
  0x17   : > { %p1970_p11 = pnand %p1506_p9, %p2390_p1  ;;  %s246_s12 = sshll.u32 %s1851_s11, 4  ;;  %s1974_s12 = int_to_ptr.vmem [resolvable:$true] %s246_s12 }
  0x19   : > { %p1640_p13 = pneg %p1970_p11 }
  0x1c   : > { %s1638_s15 = scalar_lea.hbm %s2403_s2, 256 }
  0x1d   : > { %p1639_p12 = scmp.ne.s32.totalorder %s2403_s2, %s1638_s15  ;;  %p1645_p5 = scmp.lt.u32.totalorder %s1638_s15, %s2403_s2 }
  0x1f   : > { %p1641_p0 = pnand %p1640_p13, %p1639_p12 }
  0x21   : > { %p1642_p3 = pneg %p1641_p0 }
  0x23   : > { %p1647_p7 = pnand %p1645_p5, %p1642_p3 }
  0x25   : > { %1650 = shalt.err (!%p1647_p7)
}
  0x26   : > { %s1651_s20 = scalar_lea.vmem %s1963_s9, 256  ;;  %p1659_p2 = scmp.lt.s32.totalorder %s1963_s9, %s1963_s9 }
  0x27   : > { %p1652_p9 = scmp.ne.s32.totalorder %s1963_s9, %s1651_s20  ;;  %p1660_p12 = scmp.lt.s32.totalorder %s1651_s20, %s1651_s20 }
  0x29   : > { %p1654_p10 = pnand %p1652_p9, %p1640_p13  ;;  %p1661_p0 = por %p1660_p12, %p1659_p2 }
  0x2b   : > { %p1655_p1 = pneg %p1654_p10 }
  0x2d   : > { %p1662_p6 = pnand %p1661_p0, %p1655_p1 }
  0x2f   : > { %1665 = shalt.err (!%p1662_p6)
}
  0x30   : > { %s1852_s28 = smov 64   ;;  %s1853_s8 = smov 4  }
  0x31   : > { %1509 = dma.hbm_to_vmem [thread:$0]  (!%p1970_p11), %s2403_s2, 256, %s1963_s9, [#allocation10], %s1852_s28, %s1852_s28, %s1853_s8  }
  0x32   : > { %s2404_s4 = sld [smem:[#allocation24_spill]] }
  0x38   : > { %s1666_s16 = scalar_lea.hbm %s2404_s4, 256 }
  0x39   : > { %p1667_p2 = scmp.ne.s32.totalorder %s2404_s4, %s1666_s16  ;;  %p1673_p10 = scmp.lt.u32.totalorder %s1666_s16, %s2404_s4 }
  0x3b   : > { %p1669_p1 = pnand %p1667_p2, %p1640_p13 }
  0x3d   : > { %p1670_p6 = pneg %p1669_p1 }
  0x3f   : > { %p1675_p3 = pnand %p1673_p10, %p1670_p6 }
  0x41   : > { %1678 = shalt.err (!%p1675_p3)
}
  0x42   : > { %s1679_s9 = scalar_lea.vmem %s1974_s12, 256  ;;  %p1687_p12 = scmp.lt.s32.totalorder %s1974_s12, %s1974_s12 }
  0x43   : > { %p1680_p5 = scmp.ne.s32.totalorder %s1974_s12, %s1679_s9  ;;  %p1688_p0 = scmp.lt.s32.totalorder %s1679_s9, %s1679_s9 }
  0x45   : > { %p1682_p7 = pnand %p1680_p5, %p1640_p13  ;;  %p1689_p2 = por %p1688_p0, %p1687_p12 }
  0x47   : > { %p1683_p9 = pneg %p1682_p7 }
  0x49   : > { %p1690_p1 = pnand %p1689_p2, %p1683_p9 }
  0x4b   : > { %1693 = shalt.err (!%p1690_p1)
}
  0x4c   : > { %1512 = dma.hbm_to_vmem [thread:$0]  (!%p1970_p11), %s2404_s4, 256, %s1974_s12, [#allocation13], %s1852_s28, %s1852_s28, %s1853_s8  }
  0x4d   : > { %s45_s14 = sadd.s32 1, %s1844_s25  ;;  %s54_s15 = sadd.s32 1, %s1836_s23 }
  0x4e   : > { %p47_p13 = scmp.ge.s32.totalorder %s45_s14, 2  ;;  %p61_p6 = scmp.ne.s32.totalorder %s1836_s23, %s1832_s22 }
  0x4f   : > { %p62_p10 = scmp.eq.s32.totalorder %s1848_s26, 0  ;;  %p1526_p3 = scmp.lt.s32.totalorder %s1848_s26, 2 }
  0x50   : > { %s2426_s14 = smov (%p47_p13, %s45_s14), 0  ;;  %p2406_p7 = scmp.eq.s32.totalorder %s1940_s27, 1 }
  0x51   : > { %2405 = sst [smem:[#allocation21_spill]] %s2426_s14  ;;  %p63_p5 = por %p62_p10, %p61_p6 }
  0x52   : > { %p2038_p9 = por %p2406_p7, %p61_p6  ;;  %s49_s16 = ssub.s32 %s1844_s25, %s2426_s14 }
  0x53   : > { %s263_s17 = sand.u32 1, %s1836_s23   ;;  %p52_p12 = scmp.eq.s32.totalorder %s49_s16, 0 }
  0x54   : > { %s2407_s10 = scalar_select %p2038_p9, 1, 0 }
  0x55   : > { %s2045_s12 = sshll.u32 %s263_s17, 2  ;;  %s1359_s28 = sshll.u32 %s1844_s25, 6 }
  0x56   : > { %s2049_s8 = scalar_select %p52_p12, %s1836_s23, %s54_s15  }
  0x57   : > { %s2054_s20 = scalar_lea.hbm %s2383_s0, %s1359_s28  ;;  %s267_s9 = scalar_lea.vmem [#allocation6], %s2045_s12 }
  0x58   : > { %2408 = sst [smem:[#allocation22_spill]] %s2049_s8  ;;  %s275_s11 = sshll.u32 %s267_s9, 4  ;;  %s2063_s11 = int_to_ptr.vmem [resolvable:$true] %s275_s11 }
  0x59   : > { %p2059_p11 = pnand %p1526_p3, %p63_p5  ;;  %s2068_s18 = scalar_lea.hbm %s2384_s1, %s1359_s28 }
  0x5a   : > { %s264_s19 = scalar_lea.sflag [#allocation7], %s263_s17  ;;  %s1694_s2 = scalar_lea.hbm %s2054_s20, 64 }
  0x5b   : > { %p1695_p0 = scmp.ne.s32.totalorder %s2054_s20, %s1694_s2  ;;  %p1696_p2 = pneg %p2059_p11 }
  0x5c   : > { %s1699_s14 = scalar_lea.hbm %s2383_s0, 128  ;;  %p1700_p6 = scmp.lt.u32.totalorder %s2054_s20, %s2383_s0 }
  0x5d   : > { %p1697_p1 = pnand %p1696_p2, %p1695_p0  ;;  %p1701_p10 = scmp.lt.u32.totalorder %s1699_s14, %s1694_s2 }
  0x5e   : > { %p1703_p5 = scmp.lt.u32.totalorder %s1694_s2, %s2054_s20 }
  0x5f   : > { %p1698_p13 = pneg %p1697_p1  ;;  %p1702_p3 = por %p1701_p10, %p1700_p6 }
  0x61   : > { %p1704_p7 = por %p1703_p5, %p1702_p3 }
  0x63   : > { %p1705_p12 = pnand %p1704_p7, %p1698_p13 }
  0x65   : > { %1708 = shalt.err (!%p1705_p12)
}
  0x66   : > { %s1709_s17 = scalar_lea.vmem %s2063_s11, 64  ;;  %s1854_s4 = smov [#allocation6]  }
  0x67   : > { %p1710_p0 = scmp.ne.s32.totalorder %s2063_s11, %s1709_s17  ;;  %s1714_s28 = sshll.u32 %s1854_s4, 4  ;;  %s1715_s28 = int_to_ptr.vmem [resolvable:$false] %s1714_s28 }
  0x68   : > { %s1716_s25 = scalar_lea.vmem %s1715_s28, 128  ;;  %p1717_p4 = scmp.lt.s32.totalorder %s2063_s11, %s1715_s28 }
  0x69   : > { %p1712_p1 = pnand %p1710_p0, %p1696_p2  ;;  %p1718_p6 = scmp.lt.s32.totalorder %s1716_s25, %s1709_s17 }
  0x6b   : > { %p1713_p9 = pneg %p1712_p1  ;;  %p1719_p10 = por %p1718_p6, %p1717_p4 }
  0x6d   : > { %p1720_p3 = pnand %p1719_p10, %p1713_p9 }
  0x6f   : > { %1723 = shalt.err (!%p1720_p3)
}
  0x70   : > { %1516 = dma.hbm_to_vmem [thread:$0]  (!%p2059_p11), %s2054_s20, 64, %s2063_s11, %s264_s19  }
  0x71   : > { %s282_s2 = sand.u32 1, %s1848_s26   ;;  %s286_s14 = scalar_lea.vmem [#allocation9], %s2045_s12 }
  0x72   : > { %s294_s8 = sshll.u32 %s286_s14, 4  ;;  %s283_s15 = scalar_lea.sflag [#allocation10], %s282_s2  ;;  %s295_s8 = int_to_ptr.vmem [resolvable:$true] %s294_s8 }
  0x73   : > { %s1724_s16 = scalar_lea.hbm %s2068_s18, 64  ;;  %s1729_s4 = scalar_lea.hbm %s2384_s1, 128 }
  0x74   : > { %p1725_p4 = scmp.ne.s32.totalorder %s2068_s18, %s1724_s16  ;;  %p1730_p5 = scmp.lt.u32.totalorder %s2068_s18, %s2384_s1 }
  0x75   : > { %p1731_p7 = scmp.lt.u32.totalorder %s1729_s4, %s1724_s16  ;;  %p1733_p0 = scmp.lt.u32.totalorder %s1724_s16, %s2068_s18 }
  0x76   : > { %p1727_p9 = pnand %p1725_p4, %p1696_p2 }
  0x77   : > { %p1732_p12 = por %p1731_p7, %p1730_p5 }
  0x78   : > { %p1728_p13 = pneg %p1727_p9 }
  0x79   : > { %p1734_p1 = por %p1733_p0, %p1732_p12 }
  0x7b   : > { %p1735_p6 = pnand %p1734_p1, %p1728_p13 }
  0x7d   : > { %1738 = shalt.err (!%p1735_p6)
}
  0x7e   : > { %s1739_s12 = scalar_lea.vmem %s295_s8, 64  ;;  %s1855_s20 = smov [#allocation9]  }
  0x7f   : > { %p1740_p10 = scmp.ne.s32.totalorder %s295_s8, %s1739_s12  ;;  %s1744_s11 = sshll.u32 %s1855_s20, 4  ;;  %s1745_s11 = int_to_ptr.vmem [resolvable:$false] %s1744_s11 }
  0x80   : > { %s1746_s19 = scalar_lea.vmem %s1745_s11, 128  ;;  %p1747_p9 = scmp.lt.s32.totalorder %s295_s8, %s1745_s11 }
  0x81   : > { %p1742_p3 = pnand %p1740_p10, %p1696_p2  ;;  %p1748_p8 = scmp.lt.s32.totalorder %s1746_s19, %s1739_s12 }
  0x83   : > { %p1743_p4 = pneg %p1742_p3  ;;  %p1749_p5 = por %p1748_p8, %p1747_p9 }
  0x85   : > { %p1750_p7 = pnand %p1749_p5, %p1743_p4 }
  0x87   : > { %1753 = shalt.err (!%p1750_p7)
}
  0x88   : > { %1519 = dma.hbm_to_vmem [thread:$0]  (!%p2059_p11), %s2068_s18, 64, %s295_s8, %s283_s15  }
  0x89   : > { %p2410_p13 = scmp.ne.s32.totalorder %s2401_s7, 0 }
  0x8a   : > { %s2119_s2 = sand.u32 (!%p2410_p13), 1, %s1832_s22   ;;  %p2411_p8 = scmp.ne.s32.totalorder (!%p2410_p13), %s2399_s29, 0 }
  0x8b   : > { %303 = sbr.rel (%p2410_p13) target bundleno = 1761 (0x6e1), region = 44  ;;  %s1363_s14 = sshll.u32 (!%p2410_p13), %s2119_s2, 2 }
  0x8c   : > { %s306_s16 = scalar_lea.sflag (!%p2410_p13), [#allocation7], %s2119_s2  ;;  %s2123_s9 = scalar_lea.vmem (!%p2410_p13), [#allocation6], %s1363_s14 }
  0x92   : > { %1807 = dma.done.wait (%p2411_p8), %s306_s16, 64  }
  0x93   : > { %1809 = vsyncadd (%p2411_p8), %s306_s16, 4294967232  ;;  %s314_s13 = sand.u32 1, %s1940_s27   ;;  %s2130_s18 = scalar_lea.vmem [#allocation9], %s1363_s14 }
  0x94   : > { %s315_s7 = scalar_lea.sflag [#allocation10], %s314_s13 }
  0x95   : > { %1811 = dma.done.wait (%p2411_p8), %s315_s7, 64  }
  0x96   : > { %1813 = vsyncadd (%p2411_p8), %s315_s7, 4294967232  ;;  %p2412_p11 = scmp.eq.s32.totalorder %s1940_s27, 0 }
  0x98   : > { %1815 = dma.done.wait (%p2412_p11), [#allocation10], 256   ;;  %p2413_p2 = pmov %p2412_p11 }
  0x9a   : > { %1817 = vsyncadd (%p2413_p2), [#allocation10], 4294967040  ;;  %p2414_p12 = pmov %p2413_p2 }
  0x9b   : > { %p2415_p0 = pmov %p2413_p2 }
  0x9c   : > { %1819 = dma.done.wait (%p2414_p12), [#allocation13], 256  }
  0x9d   : > { %1821 = vsyncadd (%p2415_p0), [#allocation13], 4294967040  ;;  %vm389_vm0 = vcmask 261120   ;;  %v1856_v0 = vmov 0.0   ;;  %vm1857_vm1 = vmmov 0   ;;  %v1611_v1 = vld [vmem:[#allocation11] sm:$0xff]   ;;  %v522_v37 = vlaneseq }
  0x9e   : > { %1420 = vmatprep.subr.bf16.mxu0 %v1856_v0  ;;  %1424 = vmatprep.mubr.msk.bf16.mxu0 %vm1857_vm1, %v1856_v0  ;;  %439 = vst.msk [vmem:[#allocation5] sm:$0xff] %vm389_vm0, %v1856_v0  ;;  %v1612_v2 = vld [vmem:[#allocation11 + $0x8] sm:$0xff]   ;;  %s1858_s27 = smov 96   ;;  %v1613_v3 = vld [vmem:[#allocation11] sm:$0xff]   ;;  %v1372_v5 = vld [vmem:[%s2386_s3] ss:$0 sm:$0xff] }
  0x9f   : > { %1428 = vmatprep.subr.bf16.mxu1 %v1856_v0  ;;  %1432 = vmatprep.mubr.msk.bf16.mxu1 %vm1857_vm1, %v1856_v0  ;;  %v1614_v4 = vld [vmem:[#allocation11 + $0x8] sm:$0xff]   ;;  %v365_v6 = vld [vmem:[%s2123_s9] sm:$0xf]  ;;  %v447_v9 = vld [vmem:[%s2130_s18] sm:$0xf]  ;;  %vm434_vm2 = vcmask 257024  }
  0xa0   : > { %468 = vrot.lane.b32.xlu0 %v1611_v1, %s1858_s27  ;;  %1421 = vmatpush3.bf16.msra.mxu0 %v1613_v3  ;;  %s1859_s15 = smov 120   ;;  %s1860_s17 = smov 112   ;;  %vm532_vm3 = vcmask 64512   ;;  %v523_v38 = vshrl.u32 %v522_v37, 7  ;;  %v527_v39 = vand.u32 127, %v522_v37  ;;  %vm436_vm5 = vcmask 31744  }
  0xa1   : > { %1422 = vmatprep.subr.bf16.mxu0 %v1856_v0  ;;  %474 = vrot.lane.b32.xlu1 %v1372_v5, %s1858_s27  ;;  %s1861_s4 = smov 104   ;;  %v1862_v46 = vmov -1e+30   ;;  %438 = vst.msk [vmem:[#allocation4] sm:$0xff] %vm436_vm5, %v1856_v0  ;;  %v1863_v47 = vmov 0   ;;  %vm602_vm6 = vcmask 7168  }
  0xa2   : > { %vm530_vm4 = vcmp.le.s32.totalorder %v527_v39, %v523_v38  ;;  %437 = vst.msk [vmem:[#allocation3] sm:$0xff] %vm436_vm5, %v1862_v46  ;;  %1599 = vset.pattern.permute.xlu0 %v1863_v47  ;;  %vm742_vm7 = vcmask 15368   ;;  %vm885_vm8 = vcmask 23568   ;;  %s1866_s28 = smov 88   ;;  %vm1028_vm9 = vcmask 31768   ;;  %s1868_s25 = smov 80  }
  0xa3   : > { %s1869_s12 = smov 72   ;;  %vm618_vm10 = vcmask 1043456   ;;  %s1870_s20 = smov 8   ;;  %vm805_vm11 = vcmask 130112   ;;  %vm948_vm12 = vcmask 195712   ;;  %vm1091_vm13 = vcmask 261312  }
  0xa4   : > { %470 = vrot.lane.b32.xlu0 %v1612_v2, %s1858_s27  ;;  %1423 = vmatpush3.bf16.msra.mxu0 %v1614_v4  ;;  %v1864_v2 = vmov 1   ;;  %s1871_s11 = smov 16   ;;  %s1872_s19 = smov 24  }
  0xa5   : > { %1436 = vmatprep.subr.bf16.mxu0 %v1856_v0  ;;  %1600 = vset.pattern.permute.xlu1 %v1864_v2  ;;  %s1367_s14 = sshll.u32 %s2119_s2, 3  ;;  %s1392_s13 = sshll.u32 %s1840_s24, 7 }
  0xa6   : > { %s359_s7 = scalar_lea.vmem [#allocation14], %s1367_s14  ;;  %s2333_s8 = scalar_lea.hbm %s2389_s6, %s1392_s13 }
  0xa7   : > { %1425 = vmatmul.mubr.msk.bf16.vlgmr.msra.gmra.mrb[0].mxu0 %vm389_vm0, %v365_v6  ;;  %s1226_s18 = sshll.u32 %s359_s7, 4  ;;  %s1212_s24 = scalar_lea.sflag [#allocation8], %s2119_s2  ;;  %s2335_s18 = int_to_ptr.vmem [resolvable:$true] %s1226_s18 }
  0xa8   : > { %1438 = vmatprep.mubr.msk.bf16.mxu0 %vm1857_vm1, %v1856_v0  ;;  %p2416_p6 = scmp.ne.s32.totalorder %s2407_s10, 0 }
  0xa9   : > { %v2219_v4 = vld [vmem:[#allocation3] sm:$0xff] }
 0x112   : > { %v469_v7 = vpop.permute.xlu0 %468 }
 0x113   : > { %1429 = vmatpush3.bf16.msra.mxu1 %v469_v7  ;;  %v475_v19 = vpop.permute.xlu1 %474 }
 0x114   : > { %1430 = vmatprep.subr.bf16.mxu1 %v1856_v0 }
 0x116   : > { %v471_v8 = vpop.permute.xlu0 %470 }
 0x117   : > { %1431 = vmatpush3.bf16.msra.mxu1 %v471_v8 }
 0x118   : > { %1442 = vmatprep.subr.bf16.mxu1 %v1856_v0 }
 0x11a   : > { %1433 = vmatmul.mubr.msk.bf16.vlgmr.msra.gmra.mrb[0].mxu1 %vm389_vm0, %v447_v9 }
 0x11b   : > { %1444 = vmatprep.mubr.msk.bf16.mxu1 %vm1857_vm1, %v1856_v0 }
 0x17a   : > { %v427_v10 = vpop.f32.mrb[0].mxu0 }
 0x17b   : > { %v428_v11 = vadd.f32 %v1372_v5, %v427_v10  ;;  %v1426_v12 = vpop.f32.mrb[1].mxu0 }
 0x17c   : > { %v430_v13 = vpop.f32.mrb[2].mxu0  ;;  %v1865_v12 = vmov 2  }
 0x17d   : > { %v433_v14 = vpack.c.bf16 %v428_v11, %v428_v11  ;;  %v1427_v15 = vpop.f32.mrb[3].mxu0 }
 0x17f   : > { %435 = vst.msk [vmem:[#allocation2] sm:$0xf] %vm434_vm2, %v433_v14 }
 0x186   : > { %v1615_v16 = vld [vmem:[#allocation2] ss:$0 sps:$4 sm:$0xff]  }
 0x187   : > { %669 = vrot.lane.b32.xlu0 %v1615_v16, %s1859_s15  ;;  %v1616_v17 = vld [vmem:[#allocation2] ss:$0 sps:$4 sm:$0xff]  }
 0x188   : > { %v1617_v18 = vld [vmem:[#allocation2] ss:$0 sps:$4 sm:$0xff]  }
 0x189   : > { %v531_v27 = vld [vmem:[#allocation2] sm:$0xf] }
 0x18b   : > { %812 = vrot.lane.b32.xlu0 %v1616_v17, %s1860_s17  ;;  %v1867_v17 = vmov 3  }
 0x18f   : > { %955 = vrot.lane.b32.xlu0 %v1617_v18, %s1861_s4 }
 0x1ed   : > { %v515_v20 = vpop.f32.mrb[0].mxu1 }
 0x1ee   : > { %v516_v21 = vadd.f32 %v515_v20, %v475_v19  ;;  %v1434_v22 = vpop.f32.mrb[1].mxu1 }
 0x1ef   : > { %v518_v23 = vpop.f32.mrb[2].mxu1 }
 0x1f0   : > { %v2170_v24 = vpack.c.bf16 %v516_v21, %v516_v21  ;;  %v1435_v25 = vpop.f32.mrb[3].mxu1 }
 0x1f2   : > { %671 = vrot.lane.b32.xlu1 %v2170_v24, %s1859_s15  ;;  %v537_v26 = vsel %vm532_vm3, %v2170_v24, 0  ;;  %s1754_s15 = scalar_lea.vmem %s2335_s18, 128 }
 0x1f3   : > { %1437 = vmatpush3.bf16.xpose.msra.mxu0 %v537_v26  ;;  %p1755_p1 = scmp.ne.s32.totalorder %s2335_s18, %s1754_s15 }
 0x1f4   : > { %1448 = vmatprep.subr.bf16.mxu0 %v1856_v0 }
 0x1f5   : > { %p1756_p10 = pnand %p1755_p1, %p2416_p6 }
 0x1f6   : > { %814 = vrot.lane.b32.xlu1 %v2170_v24, %s1860_s17  ;;  %s1873_s17 = smov [#allocation14]  }
 0x1f7   : > { %p1757_p3 = pneg %p1756_p10 }
 0x1f9   : > { %v670_v31 = vpop.permute.xlu0 %669 }
 0x1fa   : > { %957 = vrot.lane.b32.xlu1 %v2170_v24, %s1861_s4  ;;  %1439 = vmatmul.mubr.msk.bf16.vlgmr.msra.gmra.mrb[4].mxu0 %vm532_vm3, %v531_v27  ;;  %s1758_s4 = sshll.u32 %s1873_s17, 4  ;;  %s1759_s4 = int_to_ptr.vmem [resolvable:$false] %s1758_s4 }
 0x1fb   : > { %1450 = vmatprep.mubr.msk.bf16.mxu0 %vm1857_vm1, %v1856_v0  ;;  %p1761_p4 = scmp.lt.s32.totalorder %s2335_s18, %s1759_s4 }
 0x1fd   : > { %v813_v34 = vpop.permute.xlu0 %812 }
 0x201   : > { %v956_v36 = vpop.permute.xlu0 %955 }
 0x264   : > { %v672_v28 = vpop.permute.xlu1 %671 }
 0x265   : > { %v677_v29 = vsel %vm532_vm3, %v672_v28, 0 }
 0x266   : > { %1449 = vmatpush3.bf16.xpose.msra.mxu0 %v677_v29 }
 0x267   : > { %1460 = vmatprep.subr.bf16.mxu0 %v1856_v0 }
 0x268   : > { %v815_v30 = vpop.permute.xlu1 %814 }
 0x269   : > { %v820_v32 = vsel %vm532_vm3, %v815_v30, 0 }
 0x26c   : > { %v958_v33 = vpop.permute.xlu1 %957 }
 0x26d   : > { %1451 = vmatmul.mubr.msk.bf16.vlgmr.msra.gmra.mrb[8].mxu0 %vm532_vm3, %v670_v31  ;;  %v963_v35 = vsel %vm532_vm3, %v958_v33, 0 }
 0x26e   : > { %1461 = vmatpush3.bf16.xpose.msra.mxu0 %v820_v32  ;;  %1462 = vmatprep.mubr.msk.bf16.mxu0 %vm1857_vm1, %v1856_v0 }
 0x26f   : > { %1472 = vmatprep.subr.bf16.mxu0 %v1856_v0 }
 0x275   : > { %1463 = vmatmul.mubr.msk.bf16.vlgmr.msra.gmra.mrb[12].mxu0 %vm532_vm3, %v813_v34 }
 0x276   : > { %1473 = vmatpush3.bf16.xpose.msra.mxu0 %v963_v35  ;;  %1474 = vmatprep.mubr.msk.bf16.mxu0 %vm1857_vm1, %v1856_v0 }
 0x277   : > { %1484 = vmatprep.subr.bf16.mxu0 %v1856_v0 }
 0x27d   : > { %1475 = vmatmul.mubr.msk.bf16.vlgmr.msra.gmra.mrb[16].mxu0 %vm532_vm3, %v956_v36 }
 0x27e   : > { %1488 = vmatprep.mubr.msk.bf16.mxu0 %vm1857_vm1, %v1856_v0 }
 0x2cd   : > { %v573_v40 = vpop.f32.mrb[4].mxu0 }
 0x2ce   : > { %v2197_v41 = vsel %vm530_vm4, %v573_v40, -1e+30  ;;  %v1440_v42 = vpop.f32.mrb[5].mxu0 }
 0x2cf   : > { %v576_v43 = vpop.f32.mrb[6].mxu0  ;;  %v581_v44 = vsel %vm532_vm3, %v2197_v41, -inf }
 0x2d0   : > { %582 = vmax.xlane.f32.xlu1 %v581_v44  ;;  %v1441_v45 = vpop.f32.mrb[7].mxu0 }
 0x340   : > { %v713_v48 = vpop.f32.mrb[8].mxu0 }
 0x341   : > { %v2204_v49 = vsel %vm530_vm4, %v713_v48, -1e+30  ;;  %v1452_v50 = vpop.f32.mrb[9].mxu0 }
 0x342   : > { %v716_v51 = vpop.f32.mrb[10].mxu0  ;;  %v721_v52 = vsel %vm532_vm3, %v2204_v49, -inf }
 0x343   : > { %722 = vmax.xlane.f32.xlu0 %v721_v52  ;;  %v1453_v53 = vpop.f32.mrb[11].mxu0 }
 0x348   : > { %v856_v54 = vpop.f32.mrb[12].mxu0 }
 0x349   : > { %v2209_v55 = vsel %vm530_vm4, %v856_v54, -1e+30  ;;  %v1464_v56 = vpop.f32.mrb[13].mxu0 }
 0x34a   : > { %v859_v57 = vpop.f32.mrb[14].mxu0  ;;  %v864_v58 = vsel %vm532_vm3, %v2209_v55, -inf }
 0x34b   : > { %865 = vmax.xlane.f32.xlu0 %v864_v58  ;;  %v1465_v59 = vpop.f32.mrb[15].mxu0 }
 0x350   : > { %v999_v60 = vpop.f32.mrb[16].mxu0 }
 0x351   : > { %v2214_v61 = vsel %vm530_vm4, %v999_v60, -1e+30  ;;  %v1476_v62 = vpop.f32.mrb[17].mxu0 }
 0x352   : > { %v1002_v63 = vpop.f32.mrb[18].mxu0  ;;  %v1007_v1 = vsel %vm532_vm3, %v2214_v61, -inf }
 0x353   : > { %1008 = vmax.xlane.f32.xlu1 %v1007_v1  ;;  %v1477_v3 = vpop.f32.mrb[19].mxu0 }
 0x35d   : > { %v583_v5 = vpop.xlane.xlu1 %582 }
 0x35e   : > { %v2222_v6 = vmax.f32 %v2219_v4, %v583_v5 }
 0x360   : > { %v585_v7 = vsub.f32 %v2219_v4, %v2222_v6  ;;  %664 = vst.msk [vmem:[#allocation3] sm:$0xff] %vm602_vm6, %v2222_v6 }
 0x361   : > { %590 = vperm.xlu0 %1599, %v2222_v6  }
 0x362   : > { %v586_v52 = vmul.f32 1.442695, %v585_v7 }
 0x367   : > { %v2229_v8 = vld [vmem:[#allocation3] sm:$0xff] }
 0x3d0   : > { %v723_v9 = vpop.xlane.xlu0 %722 }
 0x3d1   : > { %v2232_v10 = vmax.f32 %v2229_v8, %v723_v9 }
 0x3d3   : > { %v725_v11 = vsub.f32 %v2229_v8, %v2232_v10  ;;  %807 = vst.msk [vmem:[#allocation3] sm:$0xff] %vm742_vm7, %v2232_v10  ;;  %730 = vperm.xlu1 %1600, %v2232_v10  }
 0x3d5   : > { %v726_v56 = vmul.f32 1.442695, %v725_v11 }
 0x3d7   : > { %613 = vrot.lane.b32.xlu1 %v2170_v24, %s1858_s27 }
 0x3d8   : > { %1601 = vset.pattern.permute.xlu1 %v1865_v12  ;;  %v866_v14 = vpop.xlane.xlu0 %865 }
 0x3da   : > { %v2242_v13 = vld [vmem:[#allocation3] sm:$0xff] }
 0x3db   : > { %v2245_v15 = vmax.f32 %v2242_v13, %v866_v14 }
 0x3dd   : > { %v868_v16 = vsub.f32 %v2242_v13, %v2245_v15  ;;  %950 = vst.msk [vmem:[#allocation3] sm:$0xff] %vm885_vm8, %v2245_v15  ;;  %873 = vperm.xlu1 %1601, %v2245_v15  }
 0x3df   : > { %v869_v57 = vmul.f32 1.442695, %v868_v16 }
 0x3e0   : > { %v1009_v19 = vpop.xlane.xlu1 %1008  ;;  %v591_v22 = vpop.permute.xlu0 %590 }
 0x3e1   : > { %752 = vrot.lane.b32.xlu1 %v2170_v24, %s1866_s28  ;;  %v593_v23 = vsub.f32 %v2197_v41, %v591_v22  ;;  %s1760_s28 = scalar_lea.vmem %s1759_s4, 256 }
 0x3e2   : > { %1602 = vset.pattern.permute.xlu1 %v1867_v17  ;;  %p1762_p9 = scmp.lt.s32.totalorder %s1760_s28, %s1754_s15 }
 0x3e3   : > { %v594_v25 = vmul.f32 1.442695, %v593_v23 }
 0x3e4   : > { %v2254_v18 = vld [vmem:[#allocation3] sm:$0xff]  ;;  %p1763_p5 = por %p1762_p9, %p1761_p4 }
 0x3e5   : > { %v2257_v20 = vmax.f32 %v2254_v18, %v1009_v19  ;;  %1620 = vpow2.f32 %v594_v25  ;;  %v604_v19 = vld [vmem:[#allocation5] sm:$0xff] }
 0x3e6   : > { %p1764_p7 = pnand %p1763_p5, %p1757_p3 }
 0x3e7   : > { %v1011_v21 = vsub.f32 %v2254_v18, %v2257_v20  ;;  %1093 = vst.msk [vmem:[#allocation3] sm:$0xff] %vm1028_vm9, %v2257_v20  ;;  %1016 = vperm.xlu1 %1602, %v2257_v20  }
 0x3e9   : > { %v1012_v7 = vmul.f32 1.442695, %v1011_v21 }
 0x3eb   : > { %895 = vrot.lane.b32.xlu1 %v2170_v24, %s1868_s25 }
 0x3ec   : > { %1603 = vset.pattern.permute.xlu1 %v1864_v2 }
 0x3ef   : > { %1038 = vrot.lane.b32.xlu1 %v2170_v24, %s1869_s12  ;;  %v1621_v26 = vpop.eup %1620 }
 0x3f0   : > { %v598_v27 = vsel %vm532_vm3, %v1621_v26, 0.0  ;;  %v611_v24 = vpack.c.bf16 %v1621_v26, %v1621_v26 }
 0x413   : > { %599 = vadd.xlane.f32.xlu1 %v598_v27 }
 0x452   : > { %v731_v28 = vpop.permute.xlu1 %730 }
 0x453   : > { %v733_v29 = vsub.f32 %v2204_v49, %v731_v28 }
 0x455   : > { %v734_v30 = vmul.f32 1.442695, %v733_v29 }
 0x456   : > { %v614_v31 = vpop.permute.xlu1 %613 }
 0x457   : > { %1622 = vpow2.f32 %v734_v30  ;;  %v620_v32 = vsel %vm618_vm10, %v614_v31, 0 }
 0x458   : > { %1443 = vmatpush3.bf16.msra.mxu1 %v620_v32 }
 0x459   : > { %1454 = vmatprep.subr.bf16.mxu1 %v1856_v0 }
 0x45b   : > { %1445 = vmatmul.mubr.msk.bf16.vlgmr.msra.gmra.mrb[4].mxu1 %vm532_vm3, %v611_v24 }
 0x45c   : > { %v874_v33 = vpop.permute.xlu1 %873  ;;  %1456 = vmatprep.mubr.msk.bf16.mxu1 %vm1857_vm1, %v1856_v0 }
 0x45d   : > { %v876_v34 = vsub.f32 %v2209_v55, %v874_v33 }
 0x45f   : > { %v877_v35 = vmul.f32 1.442695, %v876_v34 }
 0x460   : > { %v753_v36 = vpop.permute.xlu1 %752 }
 0x461   : > { %v1623_v37 = vpop.eup %1622  ;;  %1624 = vpow2.f32 %v877_v35  ;;  %v758_v38 = vsel %vm618_vm10, %v753_v36, 0 }
 0x462   : > { %1455 = vmatpush3.bf16.msra.mxu1 %v758_v38  ;;  %v738_v39 = vsel %vm532_vm3, %v1623_v37, 0.0  ;;  %v751_v40 = vpack.c.bf16 %v1623_v37, %v1623_v37 }
 0x463   : > { %739 = vadd.xlane.f32.xlu0 %v738_v39  ;;  %1466 = vmatprep.subr.bf16.mxu1 %v1856_v0 }
 0x465   : > { %1457 = vmatmul.mubr.msk.bf16.vlgmr.msra.gmra.mrb[8].mxu1 %vm532_vm3, %v751_v40  ;;  %v1618_v40 = vld [vmem:[#allocation12] sm:$0xff]  }
 0x466   : > { %v1017_v41 = vpop.permute.xlu1 %1016  ;;  %1468 = vmatprep.mubr.msk.bf16.mxu1 %vm1857_vm1, %v1856_v0  ;;  %1485 = vmatpush3.bf16.msra.mxu0 %v1618_v40 }
 0x467   : > { %v1019_v42 = vsub.f32 %v2214_v61, %v1017_v41  ;;  %v596_v61 = vld [vmem:[#allocation4] sm:$0xff]  ;;  %v1619_v41 = vld [vmem:[#allocation12 + $0x8] sm:$0xff]   ;;  %1486 = vmatprep.subr.bf16.mxu0 %v1856_v0 }
 0x469   : > { %v1020_v43 = vmul.f32 1.442695, %v1019_v42 }
 0x46a   : > { %v896_v44 = vpop.permute.xlu1 %895  ;;  %1487 = vmatpush3.bf16.msra.mxu0 %v1619_v41 }
 0x46b   : > { %v1625_v45 = vpop.eup %1624  ;;  %1626 = vpow2.f32 %v1020_v43  ;;  %v901_v46 = vsel %vm618_vm10, %v896_v44, 0 }
 0x46c   : > { %1467 = vmatpush3.bf16.msra.mxu1 %v901_v46  ;;  %v881_v48 = vsel %vm532_vm3, %v1625_v45, 0.0  ;;  %v894_v49 = vpack.c.bf16 %v1625_v45, %v1625_v45  ;;  %1628 = vpow2.f32 %v586_v52 }
 0x46d   : > { %882 = vadd.xlane.f32.xlu0 %v881_v48  ;;  %1478 = vmatprep.subr.bf16.mxu1 %v1856_v0  ;;  %1630 = vpow2.f32 %v726_v56 }
 0x46e   : > { %v1039_v50 = vpop.permute.xlu1 %1038  ;;  %1632 = vpow2.f32 %v869_v57 }
 0x46f   : > { %v1044_v51 = vsel %vm618_vm10, %v1039_v50, 0  ;;  %1469 = vmatmul.mubr.msk.bf16.vlgmr.msra.gmra.mrb[12].mxu1 %vm532_vm3, %v894_v49  ;;  %1634 = vpow2.f32 %v1012_v7 }
 0x470   : > { %1479 = vmatpush3.bf16.msra.mxu1 %v1044_v51  ;;  %1480 = vmatprep.mubr.msk.bf16.mxu1 %vm1857_vm1, %v1856_v0 }
 0x475   : > { %v1627_v53 = vpop.eup %1626 }
 0x476   : > { %v1024_v54 = vsel %vm532_vm3, %v1627_v53, 0.0  ;;  %v1037_v55 = vpack.c.bf16 %v1627_v53, %v1627_v53  ;;  %v1629_v58 = vpop.eup %1628 }
 0x477   : > { %1025 = vadd.xlane.f32.xlu1 %v1024_v54  ;;  %v1631_v59 = vpop.eup %1630  ;;  %v597_v62 = vmul.f32 %v1629_v58, %v596_v61 }
 0x478   : > { %1481 = vmatmul.mubr.msk.bf16.vlgmr.msra.gmra.mrb[16].mxu1 %vm532_vm3, %v1037_v55  ;;  %v1633_v60 = vpop.eup %1632 }
 0x479   : > { %v1635_v11 = vpop.eup %1634 }
 0x483   : > { %607 = vperm.xlu0 %1599, %v1629_v58  }
 0x487   : > { %1604 = vset.pattern.permute.xlu0 %v1865_v12 }
 0x488   : > { %890 = vperm.xlu0 %1604, %v1633_v60   ;;  %747 = vperm.xlu1 %1603, %v1631_v59  }
 0x48c   : > { %1605 = vset.pattern.permute.xlu1 %v1867_v17  ;;  %1607 = vset.pattern.permute.xlu0 %v1864_v2 }
 0x4a0   : > { %v600_v63 = vpop.xlane.xlu1 %599 }
 0x4a1   : > { %v601_v1 = vadd.f32 %v600_v63, %v597_v62 }
 0x4a3   : > { %603 = vst.msk [vmem:[#allocation4] sm:$0xff] %vm602_vm6, %v601_v1 }
 0x4aa   : > { %v736_v3 = vld [vmem:[#allocation4] sm:$0xff] }
 0x4ab   : > { %v737_v4 = vmul.f32 %v1631_v59, %v736_v3 }
 0x4f0   : > { %v740_v5 = vpop.xlane.xlu0 %739 }
 0x4f1   : > { %v741_v6 = vadd.f32 %v740_v5, %v737_v4 }
 0x4f3   : > { %743 = vst.msk [vmem:[#allocation4] sm:$0xff] %vm742_vm7, %v741_v6  ;;  %v1387_v6 = vld [vmem:[%s2388_s5] ss:$0 sm:$0xff] }
 0x4fa   : > { %v879_v8 = vld [vmem:[#allocation4] sm:$0xff]  ;;  %v883_v2 = vpop.xlane.xlu0 %882 }
 0x4fb   : > { %v880_v9 = vmul.f32 %v1633_v60, %v879_v8 }
 0x4fd   : > { %v884_v10 = vadd.f32 %v883_v2, %v880_v9 }
 0x4ff   : > { %886 = vst.msk [vmem:[#allocation4] sm:$0xff] %vm885_vm8, %v884_v10 }
 0x502   : > { %v608_v22 = vpop.permute.xlu0 %607 }
 0x503   : > { %v610_v23 = vmul.f32 %v608_v22, %v604_v19 }
 0x504   : > { %v1026_v15 = vpop.xlane.xlu1 %1025 }
 0x506   : > { %v1022_v13 = vld [vmem:[#allocation4] sm:$0xff] }
 0x507   : > { %v1023_v14 = vmul.f32 %v1635_v11, %v1022_v13 }
 0x509   : > { %v1027_v16 = vadd.f32 %v1026_v15, %v1023_v14 }
 0x50b   : > { %1029 = vst.msk [vmem:[#allocation4] sm:$0xff] %vm1028_vm9, %v1027_v16 }
 0x512   : > { %v1098_v31 = vld [vmem:[#allocation4] sm:$0xff] }
 0x513   : > { %1636 = vrcp.f32 %v1098_v31 }
 0x51d   : > { %v1637_v35 = vpop.eup %1636 }
 0x52e   : > { %v656_v25 = vpop.f32.mrb[4].mxu1 }
 0x52f   : > { %v662_v18 = vadd.f32 %v656_v25, %v610_v23  ;;  %v1446_v20 = vpop.f32.mrb[5].mxu1 }
 0x530   : > { %v659_v21 = vpop.f32.mrb[6].mxu1 }
 0x531   : > { %663 = vst.msk [vmem:[#allocation5] sm:$0xff] %vm532_vm3, %v662_v18  ;;  %v1447_v26 = vpop.f32.mrb[7].mxu1 }
 0x538   : > { %v794_v27 = vpop.f32.mrb[8].mxu1  ;;  %v744_v42 = vld [vmem:[#allocation5] sm:$0xff] }
 0x539   : > { %v1458_v28 = vpop.f32.mrb[9].mxu1  ;;  %801 = vrot.lane.b32.xlu1 %v794_v27, %s1870_s20 }
 0x53a   : > { %v797_v29 = vpop.f32.mrb[10].mxu1 }
 0x53b   : > { %v1459_v30 = vpop.f32.mrb[11].mxu1 }
 0x542   : > { %v937_v32 = vpop.f32.mrb[12].mxu1 }
 0x543   : > { %944 = vrot.lane.b32.xlu1 %v937_v32, %s1871_s11  ;;  %v1470_v24 = vpop.f32.mrb[13].mxu1 }
 0x544   : > { %v940_v33 = vpop.f32.mrb[14].mxu1 }
 0x545   : > { %v1471_v34 = vpop.f32.mrb[15].mxu1 }
 0x547   : > { %1033 = vperm.xlu1 %1605, %v1635_v11  }
 0x54b   : > { %1606 = vset.pattern.permute.xlu1 %v1863_v47  ;;  %v1080_v36 = vpop.f32.mrb[16].mxu1  ;;  %v748_v47 = vpop.permute.xlu1 %747 }
 0x54c   : > { %1087 = vrot.lane.b32.xlu0 %v1080_v36, %s1872_s19  ;;  %v1482_v37 = vpop.f32.mrb[17].mxu1  ;;  %1102 = vperm.xlu1 %1606, %v1637_v35   ;;  %v750_v43 = vmul.f32 %v748_v47, %v744_v42 }
 0x54d   : > { %v1083_v38 = vpop.f32.mrb[18].mxu1 }
 0x54e   : > { %v1483_v39 = vpop.f32.mrb[19].mxu1 }
 0x550   : > { %1113 = vperm.xlu0 %1607, %v1637_v35   ;;  %1608 = vset.pattern.permute.xlu1 %v1865_v12  ;;  %v891_v12 = vpop.permute.xlu0 %890 }
 0x551   : > { %1124 = vperm.xlu1 %1608, %v1637_v35  }
 0x554   : > { %1610 = vset.pattern.permute.xlu0 %v1867_v17 }
 0x555   : > { %1609 = vset.pattern.permute.xlu1 %v1867_v17 }
 0x556   : > { %1135 = vperm.xlu1 %1609, %v1637_v35  }
 0x5ab   : > { %v802_v44 = vpop.permute.xlu1 %801 }
 0x5ac   : > { %v804_v45 = vadd.f32 %v802_v44, %v750_v43 }
 0x5ae   : > { %806 = vst.msk [vmem:[#allocation5] sm:$0xff] %vm805_vm11, %v804_v45 }
 0x5b5   : > { %v887_v46 = vld [vmem:[#allocation5] sm:$0xff]  ;;  %v945_v17 = vpop.permute.xlu1 %944 }
 0x5b6   : > { %v893_v48 = vmul.f32 %v891_v12, %v887_v46 }
 0x5b8   : > { %v947_v49 = vadd.f32 %v945_v17, %v893_v48 }
 0x5ba   : > { %949 = vst.msk [vmem:[#allocation5] sm:$0xff] %vm948_vm12, %v947_v49 }
 0x5be   : > { %v1088_v52 = vpop.permute.xlu0 %1087 }
 0x5c1   : > { %v1030_v50 = vld [vmem:[#allocation5] sm:$0xff] }
 0x5c6   : > { %v1034_v51 = vpop.permute.xlu1 %1033 }
 0x5c7   : > { %v1036_v0 = vmul.f32 %v1034_v51, %v1030_v50 }
 0x5c9   : > { %v1090_v53 = vadd.f32 %v1088_v52, %v1036_v0 }
 0x5cb   : > { %1092 = vst.msk [vmem:[#allocation5] sm:$0xff] %vm1091_vm13, %v1090_v53  ;;  %v1103_v55 = vpop.permute.xlu1 %1102 }
 0x5cf   : > { %v1114_v57 = vpop.permute.xlu0 %1113 }
 0x5d0   : > { %v1125_v61 = vpop.permute.xlu1 %1124 }
 0x5d2   : > { %v1097_v54 = vld [vmem:[#allocation5] sm:$0xff] }
 0x5d3   : > { %v1105_v56 = vmul.f32 %v1103_v55, %v1097_v54 }
 0x5d5   : > { %1107 = vst.msk [vmem:[#allocation5] sm:$0xff] %vm532_vm3, %v1105_v56  ;;  %v1136_v1 = vpop.permute.xlu1 %1135 }
 0x5dc   : > { %v1108_v58 = vld [vmem:[#allocation5] sm:$0xff] }
 0x5dd   : > { %v1116_v59 = vmul.f32 %v1114_v57, %v1108_v58 }
 0x5df   : > { %1118 = vst.msk [vmem:[#allocation5] sm:$0xff] %vm805_vm11, %v1116_v59 }
 0x5e6   : > { %v1119_v60 = vld [vmem:[#allocation5] sm:$0xff] }
 0x5e7   : > { %v1127_v62 = vmul.f32 %v1125_v61, %v1119_v60 }
 0x5e9   : > { %1129 = vst.msk [vmem:[#allocation5] sm:$0xff] %vm948_vm12, %v1127_v62 }
 0x5f0   : > { %v1130_v63 = vld [vmem:[#allocation5] sm:$0xff] }
 0x5f1   : > { %v1138_v3 = vmul.f32 %v1136_v1, %v1130_v63 }
 0x5f3   : > { %1140 = vst.msk [vmem:[#allocation5] sm:$0xff] %vm1091_vm13, %v1138_v3 }
 0x5fa   : > { %v1141_v4 = vld [vmem:[#allocation5] sm:$0xff] }
 0x5fb   : > { %v1142_v5 = vpack.c.bf16 %v1141_v4, %v1141_v4 }
 0x5fd   : > { %1489 = vmatmul.mubr.msk.bf16.vlgmr.msra.gmra.mrb[20].mxu0 %vm389_vm0, %v1142_v5 }
 0x6d0   : > { %v1204_v7 = vpop.f32.mrb[20].mxu0 }
 0x6d1   : > { %v1205_v8 = vadd.f32 %v1387_v6, %v1204_v7  ;;  %v1490_v9 = vpop.f32.mrb[21].mxu0 }
 0x6d2   : > { %v1207_v2 = vpop.f32.mrb[22].mxu0 }
 0x6d3   : > { %v1491_v10 = vpop.f32.mrb[23].mxu0  ;;  %1210 = vst.msk [vmem:[%s359_s7] sm:$0xff] %vm389_vm0, %v1205_v8 }
 0x6d4   : > { %1767 = shalt.err (!%p1764_p7)
}
 0x6d5   : > { %s1768_s2 = scalar_lea.hbm %s2333_s8, 128  ;;  %s1772_s20 = scalar_lea.hbm %s2389_s6, 256 }
 0x6d6   : > { %p1769_p13 = scmp.ne.s32.totalorder %s2333_s8, %s1768_s2  ;;  %p1773_p2 = scmp.lt.u32.totalorder %s2333_s8, %s2389_s6 }
 0x6d7   : > { %p1774_p12 = scmp.lt.u32.totalorder %s1772_s20, %s1768_s2  ;;  %p1776_p1 = scmp.lt.u32.totalorder %s1768_s2, %s2333_s8 }
 0x6d8   : > { %p1770_p8 = pnand %p1769_p13, %p2416_p6 }
 0x6d9   : > { %p1775_p0 = por %p1774_p12, %p1773_p2 }
 0x6da   : > { %p1771_p11 = pneg %p1770_p8 }
 0x6db   : > { %p1777_p10 = por %p1776_p1, %p1775_p0 }
 0x6dd   : > { %p1778_p3 = pnand %p1777_p10, %p1771_p11 }
 0x6df   : > { %1781 = shalt.err (!%p1778_p3)
}
 0x6e0   : > { %1504 = dma.vmem_to_hbm [thread:$0]  (%p2416_p6), %s2335_s18, 128, %s2333_s8, %s1212_s24  }
 0x6e1 PF: > { %s1238_s14 = sand.u32 1, %s1828_s21   ;;  %p2417_p4 = scmp.ne.s32.totalorder %s2400_s30, 0 }
 0x6e2   : > { %p2418_p9 = scmp.ge.s32.totalorder %s1848_s26, 2  ;;  %s1239_s16 = scalar_lea.sflag [#allocation8], %s1238_s14 }
 0x6e4   : > { %p1521_p5 = pnand %p2418_p9, %p2417_p4 }
 0x6e6   : > { %1823 = dma.done.wait (!%p1521_p5), %s1239_s16, 128  }
 0x6e7   : > { %1825 = vsyncadd (!%p1521_p5), %s1239_s16, 4294967168  ;;  %s26_s26 = sadd.s32 1, %s1848_s26   ;;  %s2419_s10 = sld [smem:[#allocation22_spill]] }
 0x6e8   : > { %p23_p7 = scmp.ge.s32.totalorder %s26_s26, 4   ;;  %s2420_s24 = sld [smem:[#allocation20_spill]] }
 0x6e9   : > { %s2421_s25 = sld [smem:[#allocation21_spill]]  ;;  %s2422_s21 = smov %s1832_s22 }
 0x6ea   : > { %s2423_s22 = smov %s1836_s23  ;;  %25 = sbr.rel (!%p23_p7) target bundleno = 12 (0xc), region = 122 }
 0x6ed   : > { %s2424_s23 = smov %s2419_s10 }
 0x6f1   :  { %1244 = vsyncpa [#allocation7], 1 }
 0x6f2   :  { %1246 = vsyncpa [#allocation7 + $0x1], 1 }
 0x6f3   :  { %1247 = vsyncpa [#allocation10], 1 }
 0x6f4   :  { %1249 = vsyncpa [#allocation10 + $0x1], 1 }
 0x6f5   :  { %1250 = vsyncpa [#allocation13], 1 }
 0x6f6   :  { %1251 = vsyncpa [#allocation8], 1 }
 0x6f7   :  { %1253 = vsyncpa [#allocation8 + $0x1], 1 }

</bundles_post_ra>
